<compile_context>
chip_gen: v7x
topology: tpu7x:2x2x1
jax: 0.10.0
libtpu: 0.0.40
codegen_flags: <defaults>
</compile_context>

<pallas_src>
import math
import functools

import jax
import jax.numpy as jnp
from jax import lax
from jax.experimental import pallas as pl
from jax.experimental.pallas import tpu as pltpu

LN_EPS = 1e-5          # torch.nn.LayerNorm default
MASK_BIAS = -1e30      # finite "-inf": avoids NaN when a row sees only padded keys


def _gelu(x):
    # exact (erf-based) GELU, matching torch.nn.functional.gelu default
    return 0.5 * x * (1.0 + lax.erf(x * (1.0 / math.sqrt(2.0))))


def _round_up(x, m):
    return (x + m - 1) // m * m


# ----------------------------------------------------------------------------
# Kernel 1: fused [projection + pos-enc + L encoder layers + final GELU]
# ----------------------------------------------------------------------------
def _fused_encoder_kernel(x_ref, mb_ref, wp_ref, bp_ref, pe_ref,
                          wqkv_ref, bqkv_ref, wo_ref, bo_ref,
                          g1_ref, be1_ref, w1_ref, b1_ref, w2_ref, b2_ref,
                          g2_ref, be2_ref,
                          o_ref, act_ref, *, n_heads, d_model, seq_len, tb):
    bf16 = jnp.bfloat16
    f32 = jnp.float32
    D, S, H = d_model, seq_len, n_heads
    dh = D // H
    M = tb * S
    l = pl.program_id(1)

    # ---- layer 0 only: input projection * sqrt(D) + positional encoding ----
    @pl.when(l == 0)
    def _project():
        xf = x_ref[...].reshape(M, -1).astype(bf16)                     # (M, F)
        y = jnp.dot(xf, wp_ref[...], preferred_element_type=f32) + bp_ref[...]
        act_ref[...] = y * math.sqrt(D) + pe_ref[...]

    h = act_ref[...]                                                    # (M, D) f32
    hb = h.astype(bf16)

    # ---- fused QKV projection (1/sqrt(dh) pre-folded into the Q weights) ----
    qkv = jnp.dot(hb, wqkv_ref[0], preferred_element_type=f32) + bqkv_ref[0]
    q = qkv[:, 0 * D:1 * D].reshape(tb, S, D).astype(bf16)
    k = qkv[:, 1 * D:2 * D].reshape(tb, S, D).astype(bf16)
    v = qkv[:, 2 * D:3 * D].reshape(tb, S, D).astype(bf16)

    mb = mb_ref[...]                                                    # (tb, 1, S)
    wo = wo_ref[0]                                                      # (D, D) bf16

    # ---- per-head attention, batched over the tb rows of this block.
    # Each head's context is contracted with its (dh, D) slice of W_o and
    # accumulated in f32 -> no lane-axis concatenate, no ctx scratch.
    attn = jnp.zeros((M, D), f32)
    for hh in range(H):
        sl = slice(hh * dh, (hh + 1) * dh)
        s = jnp.einsum('bqd,bkd->bqk', q[:, :, sl], k[:, :, sl],
                       preferred_element_type=f32)                      # (tb, S, S)
        s = s + mb                                                      # mask padded keys
        s = s - jnp.max(s, axis=-1, keepdims=True)
        p = jnp.exp(s)
        p = p * pl.reciprocal(jnp.sum(p, axis=-1, keepdims=True), approx=True)
        ctx = jnp.einsum('bqk,bkd->bqd', p.astype(bf16), v[:, :, sl],
                         preferred_element_type=f32)                    # (tb, S, dh)
        attn = attn + jnp.dot(ctx.reshape(M, dh).astype(bf16), wo[sl, :],
                              preferred_element_type=f32)
    attn = attn + bo_ref[0]

    # ---- residual + LayerNorm 1 (f32 statistics) ----
    y = h + attn
    mu = jnp.mean(y, axis=-1, keepdims=True)
    var = jnp.mean(jnp.square(y - mu), axis=-1, keepdims=True)
    y = (y - mu) * lax.rsqrt(var + LN_EPS) * g1_ref[0] + be1_ref[0]

    # ---- feed-forward (GELU) + residual + LayerNorm 2 ----
    h1 = _gelu(jnp.dot(y.astype(bf16), w1_ref[0],
                       preferred_element_type=f32) + b1_ref[0])
    ff = jnp.dot(h1.astype(bf16), w2_ref[0],
                 preferred_element_type=f32) + b2_ref[0]
    z = y + ff
    mu2 = jnp.mean(z, axis=-1, keepdims=True)
    var2 = jnp.mean(jnp.square(z - mu2), axis=-1, keepdims=True)
    z = (z - mu2) * lax.rsqrt(var2 + LN_EPS) * g2_ref[0] + be2_ref[0]
    act_ref[...] = z

    # ---- last layer: final GELU, emit the (tb, S, D) block (bf16 output) ----
    @pl.when(l == pl.num_programs(1) - 1)
    def _finalize():
        o_ref[...] = _gelu(z).reshape(tb, S, D).astype(o_ref.dtype)


def _pick_batch_block(B, S, D, n_ff, budget_bytes=20 * 1024 * 1024):
    """Largest divisor of B whose rough per-block activation footprint fits a
    conservative VMEM budget (fills the MXU M dimension as much as possible).
    Lower budget_bytes when targeting v7x's 64 MiB physical VMEM."""
    best = 1
    for tb in range(1, B + 1):
        if B % tb:
            continue
        m = tb * S
        approx = 4 * m * (6 * D + n_ff) + 4 * tb * S * S * 4
        if approx <= budget_bytes:
            best = tb
    return best


def fused_encoder(x, mask_bias, pk, pe, *, d_model, n_heads):
    B, S, F = x.shape
    D = d_model
    L, _, NFF = pk["w1"].shape
    tb = _pick_batch_block(B, S, D, NFF)
    nb = B // tb
    M = tb * S
    pe_tiled = jnp.tile(pe, (tb, 1))                                    # (M, D) f32

    def fixed(shape):
        n = len(shape)
        return pl.BlockSpec(shape, lambda b, l: (0,) * n)

    def per_layer(shape):
        return pl.BlockSpec((1,) + shape, lambda b, l: (l, 0, 0))

    in_specs = [
        pl.BlockSpec((tb, S, F), lambda b, l: (b, 0, 0)),   # x
        pl.BlockSpec((tb, 1, S), lambda b, l: (b, 0, 0)),   # key-padding bias
        fixed((F, D)), fixed((1, D)), fixed((M, D)),        # wp, bp, pe (tiled)
        per_layer((D, 3 * D)), per_layer((1, 3 * D)),       # wqkv, bqkv
        per_layer((D, D)), per_layer((1, D)),               # wo, bo
        per_layer((1, D)), per_layer((1, D)),               # ln1 gamma/beta
        per_layer((D, NFF)), per_layer((1, NFF)),           # w1, b1
        per_layer((NFF, D)), per_layer((1, D)),             # w2, b2
        per_layer((1, D)), per_layer((1, D)),               # ln2 gamma/beta
    ]
    kernel = functools.partial(_fused_encoder_kernel, n_heads=n_heads,
                               d_model=D, seq_len=S, tb=tb)
    # TODO(synk): for large configs set vmem_limit_bytes per generation (v7x has
    # 64 MiB physical VMEM) and single-buffer grid-invariant weight specs.
    return pl.pallas_call(
        kernel,
        out_shape=jax.ShapeDtypeStruct((B, S, D), jnp.bfloat16),
        grid=(nb, L),
        in_specs=in_specs,
        out_specs=pl.BlockSpec((tb, S, D), lambda b, l: (b, 0, 0)),
        scratch_shapes=[pltpu.VMEM((M, D), jnp.float32)],
        compiler_params=pltpu.CompilerParams(
            dimension_semantics=("parallel", "arbitrary")),
    )(x, mask_bias, pk["wp"], pk["bp"], pe_tiled,
      pk["wqkv"], pk["bqkv"], pk["wo"], pk["bo"], pk["g1"], pk["be1"],
      pk["w1"], pk["b1"], pk["w2"], pk["b2"], pk["g2"], pk["be2"])


# ----------------------------------------------------------------------------
# Kernel 2: classification head, tiled over the K = S*d_model reduction axis
# ----------------------------------------------------------------------------
def _class_head_kernel(x_ref, w_ref, b_ref, o_ref, acc_ref):
    kk = pl.program_id(0)

    @pl.when(kk == 0)
    def _init():
        acc_ref[...] = jnp.zeros_like(acc_ref)

    acc_ref[...] += jnp.dot(x_ref[...], w_ref[...],
                            preferred_element_type=jnp.float32)

    @pl.when(kk == pl.num_programs(0) - 1)
    def _done():
        o_ref[...] = acc_ref[...] + b_ref[...]


def _pick_k_tile(K):
    for t in (2048, 1024, 512, 256, 128):
        if K % t == 0:
            return t
    return K


def class_head(x_flat, w, b):
    B, K = x_flat.shape
    Cp = w.shape[1]                     # class dim already lane-padded to 128x
    tk = _pick_k_tile(K)
    nk = K // tk
    return pl.pallas_call(
        _class_head_kernel,
        out_shape=jax.ShapeDtypeStruct((B, Cp), jnp.float32),
        grid=(nk,),
        in_specs=[
            pl.BlockSpec((B, tk), lambda kk: (0, kk)),
            pl.BlockSpec((tk, Cp), lambda kk: (kk, 0)),
            pl.BlockSpec((1, Cp), lambda kk: (0, 0)),
        ],
        out_specs=pl.BlockSpec((B, Cp), lambda kk: (0, 0)),
        scratch_shapes=[pltpu.VMEM((B, Cp), jnp.float32)],
        compiler_params=pltpu.CompilerParams(dimension_semantics=("arbitrary",)),
    )(x_flat, w, b)


# ----------------------------------------------------------------------------
# Model glue / parameters
# ----------------------------------------------------------------------------
def make_pos_encoding(max_len, d_model):
    position = jnp.arange(max_len, dtype=jnp.float32)[:, None]
    div_term = jnp.exp(jnp.arange(0, d_model, 2, dtype=jnp.float32)
                       * (-math.log(10000.0) / d_model))
    pe = jnp.zeros((max_len, d_model), jnp.float32)
    pe = pe.at[:, 0::2].set(jnp.sin(position * div_term))
    pe = pe.at[:, 1::2].set(jnp.cos(position * div_term))
    return pe


def init_params(key, feat_dim, d_model, n_heads, n_ff, num_layers, num_classes, max_len):
    keys = iter(jax.random.split(key, 8 + 12 * num_layers))

    def nrm(shape, s=0.05):
        return (s * jax.random.normal(next(keys), shape)).astype(jnp.float32)

    params = {
        "wp": nrm((feat_dim, d_model)), "bp": nrm((1, d_model)),
        "wh": nrm((max_len * d_model, num_classes)), "bh": nrm((1, num_classes)),
        "layers": [],
    }
    for _ in range(num_layers):
        params["layers"].append(dict(
            wq=nrm((d_model, d_model)), bq=nrm((1, d_model)),
            wk=nrm((d_model, d_model)), bk=nrm((1, d_model)),
            wv=nrm((d_model, d_model)), bv=nrm((1, d_model)),
            wo=nrm((d_model, d_model)), bo=nrm((1, d_model)),
            g1=jnp.ones((1, d_model), jnp.float32), be1=jnp.zeros((1, d_model), jnp.float32),
            w1=nrm((d_model, n_ff)), b1=nrm((1, n_ff)),
            w2=nrm((n_ff, d_model)), b2=nrm((1, d_model)),
            g2=jnp.ones((1, d_model), jnp.float32), be2=jnp.zeros((1, d_model), jnp.float32),
        ))
    return params


def pack_params(params, *, d_model, n_heads):
    """Fuse Q|K|V, fold 1/sqrt(dh) into the Q projection, stack per-layer
    weights on a leading layer axis, cast matmul operands to bf16 (biases and
    LayerNorm params stay f32) and lane-pad the class dim to a multiple of 128."""
    dh = d_model // n_heads
    scale = 1.0 / math.sqrt(dh)
    bf16 = jnp.bfloat16

    def stack(name):
        return jnp.stack([lp[name] for lp in params["layers"]])

    wqkv = jnp.concatenate([stack("wq") * scale, stack("wk"), stack("wv")], axis=-1)
    bqkv = jnp.concatenate([stack("bq") * scale, stack("bk"), stack("bv")], axis=-1)
    C = params["wh"].shape[1]
    Cp = _round_up(C, 128)
    wh = jnp.pad(params["wh"], ((0, 0), (0, Cp - C)))
    bh = jnp.pad(params["bh"], ((0, 0), (0, Cp - C)))
    return dict(
        wp=params["wp"].astype(bf16), bp=params["bp"],
        wqkv=wqkv.astype(bf16), bqkv=bqkv,
        wo=stack("wo").astype(bf16), bo=stack("bo"),
        g1=stack("g1"), be1=stack("be1"),
        w1=stack("w1").astype(bf16), b1=stack("b1"),
        w2=stack("w2").astype(bf16), b2=stack("b2"),
        g2=stack("g2"), be2=stack("be2"),
        wh=wh.astype(bf16), bh=bh,
    )


def tst_classifier_forward(x, mask, pk, pe, *, d_model, n_heads, num_classes):
    assert d_model % n_heads == 0
    B, S, _ = x.shape
    # src_key_padding_mask = ~mask -> large finite negative bias at padded keys
    mask_bias = jnp.where(mask, 0.0, MASK_BIAS).astype(jnp.float32).reshape(B, 1, S)
    enc = fused_encoder(x, mask_bias, pk, pe, d_model=d_model, n_heads=n_heads)
    flat = enc.reshape(B, S * d_model)     # layout plumbing outside the kernel
    logits = class_head(flat, pk["wh"], pk["bh"])
    return logits[:, :num_classes]


# ----------------------------------------------------------------------------
# Pure-JAX reference (same packed bf16 operands, standard formulation)
# ----------------------------------------------------------------------------
def _ln_ref(x, g, b):
    mu = jnp.mean(x, axis=-1, keepdims=True)
    var = jnp.mean(jnp.square(x - mu), axis=-1, keepdims=True)
    return (x - mu) * lax.rsqrt(var + LN_EPS) * g + b


def reference_forward(x, mask, pk, pe, *, d_model, n_heads, num_classes):
    bf16 = jnp.bfloat16
    f32 = jnp.float32
    B, S, _ = x.shape
    D, H = d_model, n_heads
    dh = D // H
    L = pk["wqkv"].shape[0]
    h = (jnp.einsum('bsf,fd->bsd', x.astype(bf16), pk["wp"],
                    preferred_element_type=f32) + pk["bp"]) * math.sqrt(D)
    h = h + pe[None]
    bias = jnp.where(mask, 0.0, MASK_BIAS).astype(f32)[:, None, None, :]
    for l in range(L):
        qkv = jnp.einsum('bsd,de->bse', h.astype(bf16), pk["wqkv"][l],
                         preferred_element_type=f32) + pk["bqkv"][l]
        split = lambda t: t.reshape(B, S, H, dh).transpose(0, 2, 1, 3).astype(bf16)
        q, k, v = split(qkv[..., :D]), split(qkv[..., D:2 * D]), split(qkv[..., 2 * D:])
        s = jnp.einsum('bhqd,bhkd->bhqk', q, k,
                       preferred_element_type=f32) + bias   # 1/sqrt(dh) pre-folded
        p = jax.nn.softmax(s, axis=-1)
        ctx = jnp.einsum('bhqk,bhkd->bhqd', p.astype(bf16), v,
                         preferred_element_type=f32)
        ctx = ctx.transpose(0, 2, 1, 3).reshape(B, S, D)
        attn = jnp.einsum('bsd,de->bse', ctx.astype(bf16), pk["wo"][l],
                          preferred_element_type=f32) + pk["bo"][l]
        y = _ln_ref(h + attn, pk["g1"][l], pk["be1"][l])
        h1 = _gelu(jnp.einsum('bsd,df->bsf', y.astype(bf16), pk["w1"][l],
                              preferred_element_type=f32) + pk["b1"][l])
        ff = jnp.einsum('bsf,fd->bsd', h1.astype(bf16), pk["w2"][l],
                        preferred_element_type=f32) + pk["b2"][l]
        h = _ln_ref(y + ff, pk["g2"][l], pk["be2"][l])
    act = _gelu(h).astype(bf16).reshape(B, S * D)
    logits = jnp.dot(act, pk["wh"], preferred_element_type=f32) + pk["bh"]
    return logits[:, :num_classes]


if __name__ == "__main__":
    B, S, F = 2, 8, 4                   # batch, seq (= max_len), feat_dim
    D, H, NFF, L, C = 32, 4, 64, 2, 3   # d_model, n_heads, n_ff, num_layers, num_classes

    key = jax.random.PRNGKey(0)
    kx, kp = jax.random.split(key)
    x = jax.random.normal(kx, (B, S, F), dtype=jnp.float32)
    mask = jnp.ones((B, S), dtype=bool).at[1, -1].set(False)   # pad last pos of batch 1

    raw = init_params(kp, F, D, H, NFF, L, C, S)
    pk = pack_params(raw, d_model=D, n_heads=H)
    pe = make_pos_encoding(S, D)

    out = tst_classifier_forward(x, mask, pk, pe, d_model=D, n_heads=H, num_classes=C)
    out = jax.block_until_ready(out)

    ref = reference_forward(x, mask, pk, pe, d_model=D, n_heads=H, num_classes=C)
    ref = jax.block_until_ready(ref)

    assert out.shape == (B, C)
    max_err = float(jnp.max(jnp.abs(out - ref)))
    assert jnp.allclose(out, ref, atol=2e-2, rtol=2e-2), f"mismatch vs reference, max|err|={max_err}"

    print("KERNEL_OK")
</pallas_src>

<mosaic_0001>
module attributes {stable_mosaic.version = 11 : i64} {
  func.func @_fused_encoder_kernel(%arg0: i32, %arg1: i32, %arg2: memref<2x8x4xf32, #tpu.memory_space<vmem>>, %arg3: memref<2x1x8xf32, #tpu.memory_space<vmem>>, %arg4: memref<4x32xbf16, #tpu.memory_space<vmem>>, %arg5: memref<1x32xf32, #tpu.memory_space<vmem>>, %arg6: memref<16x32xf32, #tpu.memory_space<vmem>>, %arg7: memref<1x32x96xbf16, #tpu.memory_space<vmem>>, %arg8: memref<1x1x96xf32, #tpu.memory_space<vmem>>, %arg9: memref<1x32x32xbf16, #tpu.memory_space<vmem>>, %arg10: memref<1x1x32xf32, #tpu.memory_space<vmem>>, %arg11: memref<1x1x32xf32, #tpu.memory_space<vmem>>, %arg12: memref<1x1x32xf32, #tpu.memory_space<vmem>>, %arg13: memref<1x32x64xbf16, #tpu.memory_space<vmem>>, %arg14: memref<1x1x64xf32, #tpu.memory_space<vmem>>, %arg15: memref<1x64x32xbf16, #tpu.memory_space<vmem>>, %arg16: memref<1x1x32xf32, #tpu.memory_space<vmem>>, %arg17: memref<1x1x32xf32, #tpu.memory_space<vmem>>, %arg18: memref<1x1x32xf32, #tpu.memory_space<vmem>>, %arg19: memref<2x8x32xbf16, #tpu.memory_space<vmem>>, %arg20: memref<16x32xf32, #tpu.memory_space<vmem>>) attributes {dimension_semantics = [#tpu.dimension_semantics<parallel>, #tpu.dimension_semantics<arbitrary>], iteration_bounds = array<i64: 1, 2>, scalar_prefetch = 0 : i64, scratch_operands = 1 : i64, tpu.core_type = #tpu.core_type<tc>, window_params = [{transform_indices = @transform_0, window_bounds = array<i64: 2, 8, 4>}, {transform_indices = @transform_1, window_bounds = array<i64: 2, 1, 8>}, {pipeline_mode = #tpu.pipeline_mode<synchronous>, transform_indices = @transform_2, window_bounds = array<i64: 4, 32>}, {pipeline_mode = #tpu.pipeline_mode<synchronous>, transform_indices = @transform_3, window_bounds = array<i64: 1, 32>}, {pipeline_mode = #tpu.pipeline_mode<synchronous>, transform_indices = @transform_4, window_bounds = array<i64: 16, 32>}, {transform_indices = @transform_5, window_bounds = array<i64: 1, 32, 96>}, {transform_indices = @transform_6, window_bounds = array<i64: 1, 1, 96>}, {transform_indices = @transform_7, window_bounds = array<i64: 1, 32, 32>}, {transform_indices = @transform_8, window_bounds = array<i64: 1, 1, 32>}, {transform_indices = @transform_9, window_bounds = array<i64: 1, 1, 32>}, {transform_indices = @transform_10, window_bounds = array<i64: 1, 1, 32>}, {transform_indices = @transform_11, window_bounds = array<i64: 1, 32, 64>}, {transform_indices = @transform_12, window_bounds = array<i64: 1, 1, 64>}, {transform_indices = @transform_13, window_bounds = array<i64: 1, 64, 32>}, {transform_indices = @transform_14, window_bounds = array<i64: 1, 1, 32>}, {transform_indices = @transform_15, window_bounds = array<i64: 1, 1, 32>}, {transform_indices = @transform_16, window_bounds = array<i64: 1, 1, 32>}, {transform_indices = @transform_17, window_bounds = array<i64: 2, 8, 32>}]} {
    %c0_i32 = arith.constant 0 : i32
    %0 = arith.cmpi eq, %arg1, %c0_i32 : i32
    %1 = arith.extui %0 : i1 to i32
    %c0_i32_0 = arith.constant 0 : i32
    %2 = arith.cmpi ne, %1, %c0_i32_0 : i32
    scf.if %2 {
      %c0_80 = arith.constant 0 : index
      %c0_81 = arith.constant 0 : index
      %c0_82 = arith.constant 0 : index
      %203 = vector.load %arg2[%c0_80, %c0_81, %c0_82] : memref<2x8x4xf32, #tpu.memory_space<vmem>>, vector<2x8x4xf32>
      %204 = vector.shape_cast %203 : vector<2x8x4xf32> to vector<16x4xf32>
      %205 = arith.truncf %204 : vector<16x4xf32> to vector<16x4xbf16>
      %c0_83 = arith.constant 0 : index
      %c0_84 = arith.constant 0 : index
      %206 = vector.load %arg4[%c0_83, %c0_84] : memref<4x32xbf16, #tpu.memory_space<vmem>>, vector<4x32xbf16>
      %cst_85 = arith.constant dense<0.000000e+00> : vector<16x32xf32>
      %207 = tpu.matmul %205, %206, %cst_85 {dimension_numbers = #tpu.dot_dimension_numbers<[1], [0], [0], [1], [0, 0, 1, 1], [], []>} : vector<16x4xbf16>, vector<4x32xbf16>, vector<16x32xf32> -> vector<16x32xf32>
      %c0_86 = arith.constant 0 : index
      %c0_87 = arith.constant 0 : index
      %208 = vector.load %arg5[%c0_86, %c0_87] : memref<1x32xf32, #tpu.memory_space<vmem>>, vector<1x32xf32>
      %209 = vector.broadcast %208 : vector<1x32xf32> to vector<16x32xf32>
      %210 = arith.addf %207, %209 : vector<16x32xf32>
      %cst_88 = arith.constant 5.65685415 : f32
      %211 = vector.broadcast %cst_88 : f32 to vector<16x32xf32>
      %212 = arith.mulf %210, %211 : vector<16x32xf32>
      %c0_89 = arith.constant 0 : index
      %c0_90 = arith.constant 0 : index
      %213 = vector.load %arg6[%c0_89, %c0_90] : memref<16x32xf32, #tpu.memory_space<vmem>>, vector<16x32xf32>
      %214 = arith.addf %212, %213 : vector<16x32xf32>
      %c0_91 = arith.constant 0 : index
      %c0_92 = arith.constant 0 : index
      %215 = vector.load %arg20[%c0_91, %c0_92] : memref<16x32xf32, #tpu.memory_space<vmem>>, vector<16x32xf32>
      tpu.vector_store %arg20[%c0_91, %c0_92], %214 {strides = array<i32>} : memref<16x32xf32, #tpu.memory_space<vmem>>, vector<16x32xf32>,
    } else {
    }
    %c0 = arith.constant 0 : index
    %c0_1 = arith.constant 0 : index
    %3 = vector.load %arg20[%c0, %c0_1] : memref<16x32xf32, #tpu.memory_space<vmem>>, vector<16x32xf32>
    %4 = arith.truncf %3 : vector<16x32xf32> to vector<16x32xbf16>
    %c0_2 = arith.constant 0 : index
    %c0_3 = arith.constant 0 : index
    %c0_4 = arith.constant 0 : index
    %5 = vector.load %arg7[%c0_2, %c0_3, %c0_4] : memref<1x32x96xbf16, #tpu.memory_space<vmem>>, vector<1x32x96xbf16>
    %6 = vector.shape_cast %5 : vector<1x32x96xbf16> to vector<32x96xbf16>
    %cst = arith.constant dense<0.000000e+00> : vector<16x96xf32>
    %7 = tpu.matmul %4, %6, %cst {dimension_numbers = #tpu.dot_dimension_numbers<[1], [0], [0], [1], [0, 0, 1, 1], [], []>} : vector<16x32xbf16>, vector<32x96xbf16>, vector<16x96xf32> -> vector<16x96xf32>
    %c0_5 = arith.constant 0 : index
    %c0_6 = arith.constant 0 : index
    %c0_7 = arith.constant 0 : index
    %8 = vector.load %arg8[%c0_5, %c0_6, %c0_7] : memref<1x1x96xf32, #tpu.memory_space<vmem>>, vector<1x1x96xf32>
    %9 = vector.shape_cast %8 : vector<1x1x96xf32> to vector<1x96xf32>
    %10 = vector.broadcast %9 : vector<1x96xf32> to vector<16x96xf32>
    %11 = arith.addf %7, %10 : vector<16x96xf32>
    %12 = vector.extract_strided_slice %11 {offsets = [0, 0], sizes = [16, 32], strides = [1, 1]} : vector<16x96xf32> to vector<16x32xf32>
    %13 = vector.shape_cast %12 : vector<16x32xf32> to vector<2x8x32xf32>
    %14 = arith.truncf %13 : vector<2x8x32xf32> to vector<2x8x32xbf16>
    %15 = vector.extract_strided_slice %11 {offsets = [0, 32], sizes = [16, 32], strides = [1, 1]} : vector<16x96xf32> to vector<16x32xf32>
    %16 = vector.shape_cast %15 : vector<16x32xf32> to vector<2x8x32xf32>
    %17 = arith.truncf %16 : vector<2x8x32xf32> to vector<2x8x32xbf16>
    %18 = vector.extract_strided_slice %11 {offsets = [0, 64], sizes = [16, 32], strides = [1, 1]} : vector<16x96xf32> to vector<16x32xf32>
    %19 = vector.shape_cast %18 : vector<16x32xf32> to vector<2x8x32xf32>
    %20 = arith.truncf %19 : vector<2x8x32xf32> to vector<2x8x32xbf16>
    %c0_8 = arith.constant 0 : index
    %c0_9 = arith.constant 0 : index
    %c0_10 = arith.constant 0 : index
    %21 = vector.load %arg3[%c0_8, %c0_9, %c0_10] : memref<2x1x8xf32, #tpu.memory_space<vmem>>, vector<2x1x8xf32>
    %c0_11 = arith.constant 0 : index
    %c0_12 = arith.constant 0 : index
    %c0_13 = arith.constant 0 : index
    %22 = vector.load %arg9[%c0_11, %c0_12, %c0_13] : memref<1x32x32xbf16, #tpu.memory_space<vmem>>, vector<1x32x32xbf16>
    %23 = vector.shape_cast %22 : vector<1x32x32xbf16> to vector<32x32xbf16>
    %cst_14 = arith.constant 0.000000e+00 : f32
    %24 = vector.broadcast %cst_14 : f32 to vector<16x32xf32>
    %25 = vector.extract_strided_slice %14 {offsets = [0, 0, 0], sizes = [2, 8, 8], strides = [1, 1, 1]} : vector<2x8x32xbf16> to vector<2x8x8xbf16>
    %26 = vector.extract_strided_slice %17 {offsets = [0, 0, 0], sizes = [2, 8, 8], strides = [1, 1, 1]} : vector<2x8x32xbf16> to vector<2x8x8xbf16>
    "tpu.trace_start"() <{level = 10 : i32, message = "bqd,bkd->bqk"}> : () -> ()
    %cst_15 = arith.constant dense<0.000000e+00> : vector<2x8x8xf32>
    %27 = tpu.matmul %25, %26, %cst_15 {dimension_numbers = #tpu.dot_dimension_numbers<[2], [2], [1], [1], [0, 0, 0, 1, 1, 1], [0], [0]>} : vector<2x8x8xbf16>, vector<2x8x8xbf16>, vector<2x8x8xf32> -> vector<2x8x8xf32>
    "tpu.trace_stop"() : () -> ()
    %28 = vector.broadcast %21 : vector<2x1x8xf32> to vector<2x8x8xf32>
    %29 = arith.addf %27, %28 : vector<2x8x8xf32>
    %cst_16 = arith.constant dense<0xFF800000> : vector<2x8xf32>
    %30 = vector.multi_reduction <maximumf>, %29, %cst_16 [2] : vector<2x8x8xf32> to vector<2x8xf32>
    %31 = vector.shape_cast %30 : vector<2x8xf32> to vector<2x8x1xf32>
    %32 = vector.broadcast %31 : vector<2x8x1xf32> to vector<2x8x8xf32>
    %33 = arith.subf %29, %32 : vector<2x8x8xf32>
    %34 = math.exp %33 : vector<2x8x8xf32>
    %cst_17 = arith.constant dense<0.000000e+00> : vector<2x8xf32>
    %35 = vector.multi_reduction <add>, %34, %cst_17 [2] : vector<2x8x8xf32> to vector<2x8xf32>
    %36 = vector.shape_cast %35 : vector<2x8xf32> to vector<2x8x1xf32>
    %37 = tpu.reciprocal %36 {approx = true} : vector<2x8x1xf32> -> vector<2x8x1xf32>
    %38 = vector.broadcast %37 : vector<2x8x1xf32> to vector<2x8x8xf32>
    %39 = arith.mulf %34, %38 : vector<2x8x8xf32>
    %40 = arith.truncf %39 : vector<2x8x8xf32> to vector<2x8x8xbf16>
    %41 = vector.extract_strided_slice %20 {offsets = [0, 0, 0], sizes = [2, 8, 8], strides = [1, 1, 1]} : vector<2x8x32xbf16> to vector<2x8x8xbf16>
    "tpu.trace_start"() <{level = 10 : i32, message = "bqk,bkd->bqd"}> : () -> ()
    %cst_18 = arith.constant dense<0.000000e+00> : vector<2x8x8xf32>
    %42 = tpu.matmul %40, %41, %cst_18 {dimension_numbers = #tpu.dot_dimension_numbers<[2], [1], [1], [2], [0, 0, 0, 1, 1, 2], [0], [0]>} : vector<2x8x8xbf16>, vector<2x8x8xbf16>, vector<2x8x8xf32> -> vector<2x8x8xf32>
    "tpu.trace_stop"() : () -> ()
    %43 = vector.shape_cast %42 : vector<2x8x8xf32> to vector<16x8xf32>
    %44 = arith.truncf %43 : vector<16x8xf32> to vector<16x8xbf16>
    %45 = vector.extract_strided_slice %23 {offsets = [0, 0], sizes = [8, 32], strides = [1, 1]} : vector<32x32xbf16> to vector<8x32xbf16>
    %cst_19 = arith.constant dense<0.000000e+00> : vector<16x32xf32>
    %46 = tpu.matmul %44, %45, %cst_19 {dimension_numbers = #tpu.dot_dimension_numbers<[1], [0], [0], [1], [0, 0, 1, 1], [], []>} : vector<16x8xbf16>, vector<8x32xbf16>, vector<16x32xf32> -> vector<16x32xf32>
    %47 = arith.addf %24, %46 : vector<16x32xf32>
    %48 = vector.extract_strided_slice %14 {offsets = [0, 0, 8], sizes = [2, 8, 8], strides = [1, 1, 1]} : vector<2x8x32xbf16> to vector<2x8x8xbf16>
    %49 = vector.extract_strided_slice %17 {offsets = [0, 0, 8], sizes = [2, 8, 8], strides = [1, 1, 1]} : vector<2x8x32xbf16> to vector<2x8x8xbf16>
    "tpu.trace_start"() <{level = 10 : i32, message = "bqd,bkd->bqk"}> : () -> ()
    %cst_20 = arith.constant dense<0.000000e+00> : vector<2x8x8xf32>
    %50 = tpu.matmul %48, %49, %cst_20 {dimension_numbers = #tpu.dot_dimension_numbers<[2], [2], [1], [1], [0, 0, 0, 1, 1, 1], [0], [0]>} : vector<2x8x8xbf16>, vector<2x8x8xbf16>, vector<2x8x8xf32> -> vector<2x8x8xf32>
    "tpu.trace_stop"() : () -> ()
    %51 = vector.broadcast %21 : vector<2x1x8xf32> to vector<2x8x8xf32>
    %52 = arith.addf %50, %51 : vector<2x8x8xf32>
    %cst_21 = arith.constant dense<0xFF800000> : vector<2x8xf32>
    %53 = vector.multi_reduction <maximumf>, %52, %cst_21 [2] : vector<2x8x8xf32> to vector<2x8xf32>
    %54 = vector.shape_cast %53 : vector<2x8xf32> to vector<2x8x1xf32>
    %55 = vector.broadcast %54 : vector<2x8x1xf32> to vector<2x8x8xf32>
    %56 = arith.subf %52, %55 : vector<2x8x8xf32>
    %57 = math.exp %56 : vector<2x8x8xf32>
    %cst_22 = arith.constant dense<0.000000e+00> : vector<2x8xf32>
    %58 = vector.multi_reduction <add>, %57, %cst_22 [2] : vector<2x8x8xf32> to vector<2x8xf32>
    %59 = vector.shape_cast %58 : vector<2x8xf32> to vector<2x8x1xf32>
    %60 = tpu.reciprocal %59 {approx = true} : vector<2x8x1xf32> -> vector<2x8x1xf32>
    %61 = vector.broadcast %60 : vector<2x8x1xf32> to vector<2x8x8xf32>
    %62 = arith.mulf %57, %61 : vector<2x8x8xf32>
    %63 = arith.truncf %62 : vector<2x8x8xf32> to vector<2x8x8xbf16>
    %64 = vector.extract_strided_slice %20 {offsets = [0, 0, 8], sizes = [2, 8, 8], strides = [1, 1, 1]} : vector<2x8x32xbf16> to vector<2x8x8xbf16>
    "tpu.trace_start"() <{level = 10 : i32, message = "bqk,bkd->bqd"}> : () -> ()
    %cst_23 = arith.constant dense<0.000000e+00> : vector<2x8x8xf32>
    %65 = tpu.matmul %63, %64, %cst_23 {dimension_numbers = #tpu.dot_dimension_numbers<[2], [1], [1], [2], [0, 0, 0, 1, 1, 2], [0], [0]>} : vector<2x8x8xbf16>, vector<2x8x8xbf16>, vector<2x8x8xf32> -> vector<2x8x8xf32>
    "tpu.trace_stop"() : () -> ()
    %66 = vector.shape_cast %65 : vector<2x8x8xf32> to vector<16x8xf32>
    %67 = arith.truncf %66 : vector<16x8xf32> to vector<16x8xbf16>
    %68 = vector.extract_strided_slice %23 {offsets = [8, 0], sizes = [8, 32], strides = [1, 1]} : vector<32x32xbf16> to vector<8x32xbf16>
    %cst_24 = arith.constant dense<0.000000e+00> : vector<16x32xf32>
    %69 = tpu.matmul %67, %68, %cst_24 {dimension_numbers = #tpu.dot_dimension_numbers<[1], [0], [0], [1], [0, 0, 1, 1], [], []>} : vector<16x8xbf16>, vector<8x32xbf16>, vector<16x32xf32> -> vector<16x32xf32>
    %70 = arith.addf %47, %69 : vector<16x32xf32>
    %71 = vector.extract_strided_slice %14 {offsets = [0, 0, 16], sizes = [2, 8, 8], strides = [1, 1, 1]} : vector<2x8x32xbf16> to vector<2x8x8xbf16>
    %72 = vector.extract_strided_slice %17 {offsets = [0, 0, 16], sizes = [2, 8, 8], strides = [1, 1, 1]} : vector<2x8x32xbf16> to vector<2x8x8xbf16>
    "tpu.trace_start"() <{level = 10 : i32, message = "bqd,bkd->bqk"}> : () -> ()
    %cst_25 = arith.constant dense<0.000000e+00> : vector<2x8x8xf32>
    %73 = tpu.matmul %71, %72, %cst_25 {dimension_numbers = #tpu.dot_dimension_numbers<[2], [2], [1], [1], [0, 0, 0, 1, 1, 1], [0], [0]>} : vector<2x8x8xbf16>, vector<2x8x8xbf16>, vector<2x8x8xf32> -> vector<2x8x8xf32>
    "tpu.trace_stop"() : () -> ()
    %74 = vector.broadcast %21 : vector<2x1x8xf32> to vector<2x8x8xf32>
    %75 = arith.addf %73, %74 : vector<2x8x8xf32>
    %cst_26 = arith.constant dense<0xFF800000> : vector<2x8xf32>
    %76 = vector.multi_reduction <maximumf>, %75, %cst_26 [2] : vector<2x8x8xf32> to vector<2x8xf32>
    %77 = vector.shape_cast %76 : vector<2x8xf32> to vector<2x8x1xf32>
    %78 = vector.broadcast %77 : vector<2x8x1xf32> to vector<2x8x8xf32>
    %79 = arith.subf %75, %78 : vector<2x8x8xf32>
    %80 = math.exp %79 : vector<2x8x8xf32>
    %cst_27 = arith.constant dense<0.000000e+00> : vector<2x8xf32>
    %81 = vector.multi_reduction <add>, %80, %cst_27 [2] : vector<2x8x8xf32> to vector<2x8xf32>
    %82 = vector.shape_cast %81 : vector<2x8xf32> to vector<2x8x1xf32>
    %83 = tpu.reciprocal %82 {approx = true} : vector<2x8x1xf32> -> vector<2x8x1xf32>
    %84 = vector.broadcast %83 : vector<2x8x1xf32> to vector<2x8x8xf32>
    %85 = arith.mulf %80, %84 : vector<2x8x8xf32>
    %86 = arith.truncf %85 : vector<2x8x8xf32> to vector<2x8x8xbf16>
    %87 = vector.extract_strided_slice %20 {offsets = [0, 0, 16], sizes = [2, 8, 8], strides = [1, 1, 1]} : vector<2x8x32xbf16> to vector<2x8x8xbf16>
    "tpu.trace_start"() <{level = 10 : i32, message = "bqk,bkd->bqd"}> : () -> ()
    %cst_28 = arith.constant dense<0.000000e+00> : vector<2x8x8xf32>
    %88 = tpu.matmul %86, %87, %cst_28 {dimension_numbers = #tpu.dot_dimension_numbers<[2], [1], [1], [2], [0, 0, 0, 1, 1, 2], [0], [0]>} : vector<2x8x8xbf16>, vector<2x8x8xbf16>, vector<2x8x8xf32> -> vector<2x8x8xf32>
    "tpu.trace_stop"() : () -> ()
    %89 = vector.shape_cast %88 : vector<2x8x8xf32> to vector<16x8xf32>
    %90 = arith.truncf %89 : vector<16x8xf32> to vector<16x8xbf16>
    %91 = vector.extract_strided_slice %23 {offsets = [16, 0], sizes = [8, 32], strides = [1, 1]} : vector<32x32xbf16> to vector<8x32xbf16>
    %cst_29 = arith.constant dense<0.000000e+00> : vector<16x32xf32>
    %92 = tpu.matmul %90, %91, %cst_29 {dimension_numbers = #tpu.dot_dimension_numbers<[1], [0], [0], [1], [0, 0, 1, 1], [], []>} : vector<16x8xbf16>, vector<8x32xbf16>, vector<16x32xf32> -> vector<16x32xf32>
    %93 = arith.addf %70, %92 : vector<16x32xf32>
    %94 = vector.extract_strided_slice %14 {offsets = [0, 0, 24], sizes = [2, 8, 8], strides = [1, 1, 1]} : vector<2x8x32xbf16> to vector<2x8x8xbf16>
    %95 = vector.extract_strided_slice %17 {offsets = [0, 0, 24], sizes = [2, 8, 8], strides = [1, 1, 1]} : vector<2x8x32xbf16> to vector<2x8x8xbf16>
    "tpu.trace_start"() <{level = 10 : i32, message = "bqd,bkd->bqk"}> : () -> ()
    %cst_30 = arith.constant dense<0.000000e+00> : vector<2x8x8xf32>
    %96 = tpu.matmul %94, %95, %cst_30 {dimension_numbers = #tpu.dot_dimension_numbers<[2], [2], [1], [1], [0, 0, 0, 1, 1, 1], [0], [0]>} : vector<2x8x8xbf16>, vector<2x8x8xbf16>, vector<2x8x8xf32> -> vector<2x8x8xf32>
    "tpu.trace_stop"() : () -> ()
    %97 = vector.broadcast %21 : vector<2x1x8xf32> to vector<2x8x8xf32>
    %98 = arith.addf %96, %97 : vector<2x8x8xf32>
    %cst_31 = arith.constant dense<0xFF800000> : vector<2x8xf32>
    %99 = vector.multi_reduction <maximumf>, %98, %cst_31 [2] : vector<2x8x8xf32> to vector<2x8xf32>
    %100 = vector.shape_cast %99 : vector<2x8xf32> to vector<2x8x1xf32>
    %101 = vector.broadcast %100 : vector<2x8x1xf32> to vector<2x8x8xf32>
    %102 = arith.subf %98, %101 : vector<2x8x8xf32>
    %103 = math.exp %102 : vector<2x8x8xf32>
    %cst_32 = arith.constant dense<0.000000e+00> : vector<2x8xf32>
    %104 = vector.multi_reduction <add>, %103, %cst_32 [2] : vector<2x8x8xf32> to vector<2x8xf32>
    %105 = vector.shape_cast %104 : vector<2x8xf32> to vector<2x8x1xf32>
    %106 = tpu.reciprocal %105 {approx = true} : vector<2x8x1xf32> -> vector<2x8x1xf32>
    %107 = vector.broadcast %106 : vector<2x8x1xf32> to vector<2x8x8xf32>
    %108 = arith.mulf %103, %107 : vector<2x8x8xf32>
    %109 = arith.truncf %108 : vector<2x8x8xf32> to vector<2x8x8xbf16>
    %110 = vector.extract_strided_slice %20 {offsets = [0, 0, 24], sizes = [2, 8, 8], strides = [1, 1, 1]} : vector<2x8x32xbf16> to vector<2x8x8xbf16>
    "tpu.trace_start"() <{level = 10 : i32, message = "bqk,bkd->bqd"}> : () -> ()
    %cst_33 = arith.constant dense<0.000000e+00> : vector<2x8x8xf32>
    %111 = tpu.matmul %109, %110, %cst_33 {dimension_numbers = #tpu.dot_dimension_numbers<[2], [1], [1], [2], [0, 0, 0, 1, 1, 2], [0], [0]>} : vector<2x8x8xbf16>, vector<2x8x8xbf16>, vector<2x8x8xf32> -> vector<2x8x8xf32>
    "tpu.trace_stop"() : () -> ()
    %112 = vector.shape_cast %111 : vector<2x8x8xf32> to vector<16x8xf32>
    %113 = arith.truncf %112 : vector<16x8xf32> to vector<16x8xbf16>
    %114 = vector.extract_strided_slice %23 {offsets = [24, 0], sizes = [8, 32], strides = [1, 1]} : vector<32x32xbf16> to vector<8x32xbf16>
    %cst_34 = arith.constant dense<0.000000e+00> : vector<16x32xf32>
    %115 = tpu.matmul %113, %114, %cst_34 {dimension_numbers = #tpu.dot_dimension_numbers<[1], [0], [0], [1], [0, 0, 1, 1], [], []>} : vector<16x8xbf16>, vector<8x32xbf16>, vector<16x32xf32> -> vector<16x32xf32>
    %116 = arith.addf %93, %115 : vector<16x32xf32>
    %c0_35 = arith.constant 0 : index
    %c0_36 = arith.constant 0 : index
    %c0_37 = arith.constant 0 : index
    %117 = vector.load %arg10[%c0_35, %c0_36, %c0_37] : memref<1x1x32xf32, #tpu.memory_space<vmem>>, vector<1x1x32xf32>
    %118 = vector.shape_cast %117 : vector<1x1x32xf32> to vector<1x32xf32>
    %119 = vector.broadcast %118 : vector<1x32xf32> to vector<16x32xf32>
    %120 = arith.addf %116, %119 : vector<16x32xf32>
    %121 = arith.addf %3, %120 : vector<16x32xf32>
    %cst_38 = arith.constant dense<0.000000e+00> : vector<16xf32>
    %122 = vector.multi_reduction <add>, %121, %cst_38 [1] : vector<16x32xf32> to vector<16xf32>
    %123 = vector.shape_cast %122 : vector<16xf32> to vector<16x1xf32>
    %cst_39 = arith.constant 3.200000e+01 : f32
    %124 = vector.broadcast %cst_39 : f32 to vector<16x1xf32>
    %125 = arith.divf %123, %124 : vector<16x1xf32>
    %126 = vector.broadcast %125 : vector<16x1xf32> to vector<16x32xf32>
    %127 = arith.subf %121, %126 : vector<16x32xf32>
    %128 = arith.mulf %127, %127 : vector<16x32xf32>
    %cst_40 = arith.constant dense<0.000000e+00> : vector<16xf32>
    %129 = vector.multi_reduction <add>, %128, %cst_40 [1] : vector<16x32xf32> to vector<16xf32>
    %130 = vector.shape_cast %129 : vector<16xf32> to vector<16x1xf32>
    %cst_41 = arith.constant 3.200000e+01 : f32
    %131 = vector.broadcast %cst_41 : f32 to vector<16x1xf32>
    %132 = arith.divf %130, %131 : vector<16x1xf32>
    %133 = vector.broadcast %125 : vector<16x1xf32> to vector<16x32xf32>
    %134 = arith.subf %121, %133 : vector<16x32xf32>
    %cst_42 = arith.constant 9.99999974E-6 : f32
    %135 = vector.broadcast %cst_42 : f32 to vector<16x1xf32>
    %136 = arith.addf %132, %135 : vector<16x1xf32>
    %137 = math.rsqrt %136 : vector<16x1xf32>
    %138 = vector.broadcast %137 : vector<16x1xf32> to vector<16x32xf32>
    %139 = arith.mulf %134, %138 : vector<16x32xf32>
    %c0_43 = arith.constant 0 : index
    %c0_44 = arith.constant 0 : index
    %c0_45 = arith.constant 0 : index
    %140 = vector.load %arg11[%c0_43, %c0_44, %c0_45] : memref<1x1x32xf32, #tpu.memory_space<vmem>>, vector<1x1x32xf32>
    %141 = vector.shape_cast %140 : vector<1x1x32xf32> to vector<1x32xf32>
    %142 = vector.broadcast %141 : vector<1x32xf32> to vector<16x32xf32>
    %143 = arith.mulf %139, %142 : vector<16x32xf32>
    %c0_46 = arith.constant 0 : index
    %c0_47 = arith.constant 0 : index
    %c0_48 = arith.constant 0 : index
    %144 = vector.load %arg12[%c0_46, %c0_47, %c0_48] : memref<1x1x32xf32, #tpu.memory_space<vmem>>, vector<1x1x32xf32>
    %145 = vector.shape_cast %144 : vector<1x1x32xf32> to vector<1x32xf32>
    %146 = vector.broadcast %145 : vector<1x32xf32> to vector<16x32xf32>
    %147 = arith.addf %143, %146 : vector<16x32xf32>
    %148 = arith.truncf %147 : vector<16x32xf32> to vector<16x32xbf16>
    %c0_49 = arith.constant 0 : index
    %c0_50 = arith.constant 0 : index
    %c0_51 = arith.constant 0 : index
    %149 = vector.load %arg13[%c0_49, %c0_50, %c0_51] : memref<1x32x64xbf16, #tpu.memory_space<vmem>>, vector<1x32x64xbf16>
    %150 = vector.shape_cast %149 : vector<1x32x64xbf16> to vector<32x64xbf16>
    %cst_52 = arith.constant dense<0.000000e+00> : vector<16x64xf32>
    %151 = tpu.matmul %148, %150, %cst_52 {dimension_numbers = #tpu.dot_dimension_numbers<[1], [0], [0], [1], [0, 0, 1, 1], [], []>} : vector<16x32xbf16>, vector<32x64xbf16>, vector<16x64xf32> -> vector<16x64xf32>
    %c0_53 = arith.constant 0 : index
    %c0_54 = arith.constant 0 : index
    %c0_55 = arith.constant 0 : index
    %152 = vector.load %arg14[%c0_53, %c0_54, %c0_55] : memref<1x1x64xf32, #tpu.memory_space<vmem>>, vector<1x1x64xf32>
    %153 = vector.shape_cast %152 : vector<1x1x64xf32> to vector<1x64xf32>
    %154 = vector.broadcast %153 : vector<1x64xf32> to vector<16x64xf32>
    %155 = arith.addf %151, %154 : vector<16x64xf32>
    %cst_56 = arith.constant 5.000000e-01 : f32
    %156 = vector.broadcast %cst_56 : f32 to vector<16x64xf32>
    %157 = arith.mulf %156, %155 : vector<16x64xf32>
    %cst_57 = arith.constant 0.707106769 : f32
    %158 = vector.broadcast %cst_57 : f32 to vector<16x64xf32>
    %159 = arith.mulf %155, %158 : vector<16x64xf32>
    %160 = math.erf %159 : vector<16x64xf32>
    %cst_58 = arith.constant 1.000000e+00 : f32
    %161 = vector.broadcast %cst_58 : f32 to vector<16x64xf32>
    %162 = arith.addf %161, %160 : vector<16x64xf32>
    %163 = arith.mulf %157, %162 : vector<16x64xf32>
    %164 = arith.truncf %163 : vector<16x64xf32> to vector<16x64xbf16>
    %c0_59 = arith.constant 0 : index
    %c0_60 = arith.constant 0 : index
    %c0_61 = arith.constant 0 : index
    %165 = vector.load %arg15[%c0_59, %c0_60, %c0_61] : memref<1x64x32xbf16, #tpu.memory_space<vmem>>, vector<1x64x32xbf16>
    %166 = vector.shape_cast %165 : vector<1x64x32xbf16> to vector<64x32xbf16>
    %cst_62 = arith.constant dense<0.000000e+00> : vector<16x32xf32>
    %167 = tpu.matmul %164, %166, %cst_62 {dimension_numbers = #tpu.dot_dimension_numbers<[1], [0], [0], [1], [0, 0, 1, 1], [], []>} : vector<16x64xbf16>, vector<64x32xbf16>, vector<16x32xf32> -> vector<16x32xf32>
    %c0_63 = arith.constant 0 : index
    %c0_64 = arith.constant 0 : index
    %c0_65 = arith.constant 0 : index
    %168 = vector.load %arg16[%c0_63, %c0_64, %c0_65] : memref<1x1x32xf32, #tpu.memory_space<vmem>>, vector<1x1x32xf32>
    %169 = vector.shape_cast %168 : vector<1x1x32xf32> to vector<1x32xf32>
    %170 = vector.broadcast %169 : vector<1x32xf32> to vector<16x32xf32>
    %171 = arith.addf %167, %170 : vector<16x32xf32>
    %172 = arith.addf %147, %171 : vector<16x32xf32>
    %cst_66 = arith.constant dense<0.000000e+00> : vector<16xf32>
    %173 = vector.multi_reduction <add>, %172, %cst_66 [1] : vector<16x32xf32> to vector<16xf32>
    %174 = vector.shape_cast %173 : vector<16xf32> to vector<16x1xf32>
    %cst_67 = arith.constant 3.200000e+01 : f32
    %175 = vector.broadcast %cst_67 : f32 to vector<16x1xf32>
    %176 = arith.divf %174, %175 : vector<16x1xf32>
    %177 = vector.broadcast %176 : vector<16x1xf32> to vector<16x32xf32>
    %178 = arith.subf %172, %177 : vector<16x32xf32>
    %179 = arith.mulf %178, %178 : vector<16x32xf32>
    %cst_68 = arith.constant dense<0.000000e+00> : vector<16xf32>
    %180 = vector.multi_reduction <add>, %179, %cst_68 [1] : vector<16x32xf32> to vector<16xf32>
    %181 = vector.shape_cast %180 : vector<16xf32> to vector<16x1xf32>
    %cst_69 = arith.constant 3.200000e+01 : f32
    %182 = vector.broadcast %cst_69 : f32 to vector<16x1xf32>
    %183 = arith.divf %181, %182 : vector<16x1xf32>
    %184 = vector.broadcast %176 : vector<16x1xf32> to vector<16x32xf32>
    %185 = arith.subf %172, %184 : vector<16x32xf32>
    %cst_70 = arith.constant 9.99999974E-6 : f32
    %186 = vector.broadcast %cst_70 : f32 to vector<16x1xf32>
    %187 = arith.addf %183, %186 : vector<16x1xf32>
    %188 = math.rsqrt %187 : vector<16x1xf32>
    %189 = vector.broadcast %188 : vector<16x1xf32> to vector<16x32xf32>
    %190 = arith.mulf %185, %189 : vector<16x32xf32>
    %c0_71 = arith.constant 0 : index
    %c0_72 = arith.constant 0 : index
    %c0_73 = arith.constant 0 : index
    %191 = vector.load %arg17[%c0_71, %c0_72, %c0_73] : memref<1x1x32xf32, #tpu.memory_space<vmem>>, vector<1x1x32xf32>
    %192 = vector.shape_cast %191 : vector<1x1x32xf32> to vector<1x32xf32>
    %193 = vector.broadcast %192 : vector<1x32xf32> to vector<16x32xf32>
    %194 = arith.mulf %190, %193 : vector<16x32xf32>
    %c0_74 = arith.constant 0 : index
    %c0_75 = arith.constant 0 : index
    %c0_76 = arith.constant 0 : index
    %195 = vector.load %arg18[%c0_74, %c0_75, %c0_76] : memref<1x1x32xf32, #tpu.memory_space<vmem>>, vector<1x1x32xf32>
    %196 = vector.shape_cast %195 : vector<1x1x32xf32> to vector<1x32xf32>
    %197 = vector.broadcast %196 : vector<1x32xf32> to vector<16x32xf32>
    %198 = arith.addf %194, %197 : vector<16x32xf32>
    %c0_77 = arith.constant 0 : index
    %c0_78 = arith.constant 0 : index
    %199 = vector.load %arg20[%c0_77, %c0_78] : memref<16x32xf32, #tpu.memory_space<vmem>>, vector<16x32xf32>
    tpu.vector_store %arg20[%c0_77, %c0_78], %198 {strides = array<i32>} : memref<16x32xf32, #tpu.memory_space<vmem>>, vector<16x32xf32>,
    %c1_i32 = arith.constant 1 : i32
    %200 = arith.cmpi eq, %arg1, %c1_i32 : i32
    %201 = arith.extui %200 : i1 to i32
    %c0_i32_79 = arith.constant 0 : i32
    %202 = arith.cmpi ne, %201, %c0_i32_79 : i32
    scf.if %202 {
      %cst_80 = arith.constant 5.000000e-01 : f32
      %203 = vector.broadcast %cst_80 : f32 to vector<16x32xf32>
      %204 = arith.mulf %203, %198 : vector<16x32xf32>
      %cst_81 = arith.constant 0.707106769 : f32
      %205 = vector.broadcast %cst_81 : f32 to vector<16x32xf32>
      %206 = arith.mulf %198, %205 : vector<16x32xf32>
      %207 = math.erf %206 : vector<16x32xf32>
      %cst_82 = arith.constant 1.000000e+00 : f32
      %208 = vector.broadcast %cst_82 : f32 to vector<16x32xf32>
      %209 = arith.addf %208, %207 : vector<16x32xf32>
      %210 = arith.mulf %204, %209 : vector<16x32xf32>
      %211 = vector.shape_cast %210 : vector<16x32xf32> to vector<2x8x32xf32>
      %212 = arith.truncf %211 : vector<2x8x32xf32> to vector<2x8x32xbf16>
      %c0_83 = arith.constant 0 : index
      %c0_84 = arith.constant 0 : index
      %c0_85 = arith.constant 0 : index
      %213 = vector.load %arg19[%c0_83, %c0_84, %c0_85] : memref<2x8x32xbf16, #tpu.memory_space<vmem>>, vector<2x8x32xbf16>
      tpu.vector_store %arg19[%c0_83, %c0_84, %c0_85], %212 {strides = array<i32>} : memref<2x8x32xbf16, #tpu.memory_space<vmem>>, vector<2x8x32xbf16>,
    } else {
    }
    return
  }
  func.func @transform_0(%arg0: i32, %arg1: i32) -> (i32, i32, i32) {
    %c0_i32 = arith.constant 0 : i32
    %c0_i32_0 = arith.constant 0 : i32
    %c0_i32_1 = arith.constant 0 : i32
    return %arg0, %c0_i32, %c0_i32_0 : i32, i32, i32
  }
  func.func @transform_1(%arg0: i32, %arg1: i32) -> (i32, i32, i32) {
    %c0_i32 = arith.constant 0 : i32
    %c0_i32_0 = arith.constant 0 : i32
    %c0_i32_1 = arith.constant 0 : i32
    return %arg0, %c0_i32, %c0_i32_0 : i32, i32, i32
  }
  func.func @transform_2(%arg0: i32, %arg1: i32) -> (i32, i32) {
    %c0_i32 = arith.constant 0 : i32
    %c0_i32_0 = arith.constant 0 : i32
    %c0_i32_1 = arith.constant 0 : i32
    return %c0_i32, %c0_i32_0 : i32, i32
  }
  func.func @transform_3(%arg0: i32, %arg1: i32) -> (i32, i32) {
    %c0_i32 = arith.constant 0 : i32
    %c0_i32_0 = arith.constant 0 : i32
    %c0_i32_1 = arith.constant 0 : i32
    return %c0_i32, %c0_i32_0 : i32, i32
  }
  func.func @transform_4(%arg0: i32, %arg1: i32) -> (i32, i32) {
    %c0_i32 = arith.constant 0 : i32
    %c0_i32_0 = arith.constant 0 : i32
    %c0_i32_1 = arith.constant 0 : i32
    return %c0_i32, %c0_i32_0 : i32, i32
  }
  func.func @transform_5(%arg0: i32, %arg1: i32) -> (i32, i32, i32) {
    %c0_i32 = arith.constant 0 : i32
    %c0_i32_0 = arith.constant 0 : i32
    %c0_i32_1 = arith.constant 0 : i32
    return %arg1, %c0_i32, %c0_i32_0 : i32, i32, i32
  }
  func.func @transform_6(%arg0: i32, %arg1: i32) -> (i32, i32, i32) {
    %c0_i32 = arith.constant 0 : i32
    %c0_i32_0 = arith.constant 0 : i32
    %c0_i32_1 = arith.constant 0 : i32
    return %arg1, %c0_i32, %c0_i32_0 : i32, i32, i32
  }
  func.func @transform_7(%arg0: i32, %arg1: i32) -> (i32, i32, i32) {
    %c0_i32 = arith.constant 0 : i32
    %c0_i32_0 = arith.constant 0 : i32
    %c0_i32_1 = arith.constant 0 : i32
    return %arg1, %c0_i32, %c0_i32_0 : i32, i32, i32
  }
  func.func @transform_8(%arg0: i32, %arg1: i32) -> (i32, i32, i32) {
    %c0_i32 = arith.constant 0 : i32
    %c0_i32_0 = arith.constant 0 : i32
    %c0_i32_1 = arith.constant 0 : i32
    return %arg1, %c0_i32, %c0_i32_0 : i32, i32, i32
  }
  func.func @transform_9(%arg0: i32, %arg1: i32) -> (i32, i32, i32) {
    %c0_i32 = arith.constant 0 : i32
    %c0_i32_0 = arith.constant 0 : i32
    %c0_i32_1 = arith.constant 0 : i32
    return %arg1, %c0_i32, %c0_i32_0 : i32, i32, i32
  }
  func.func @transform_10(%arg0: i32, %arg1: i32) -> (i32, i32, i32) {
    %c0_i32 = arith.constant 0 : i32
    %c0_i32_0 = arith.constant 0 : i32
    %c0_i32_1 = arith.constant 0 : i32
    return %arg1, %c0_i32, %c0_i32_0 : i32, i32, i32
  }
  func.func @transform_11(%arg0: i32, %arg1: i32) -> (i32, i32, i32) {
    %c0_i32 = arith.constant 0 : i32
    %c0_i32_0 = arith.constant 0 : i32
    %c0_i32_1 = arith.constant 0 : i32
    return %arg1, %c0_i32, %c0_i32_0 : i32, i32, i32
  }
  func.func @transform_12(%arg0: i32, %arg1: i32) -> (i32, i32, i32) {
    %c0_i32 = arith.constant 0 : i32
    %c0_i32_0 = arith.constant 0 : i32
    %c0_i32_1 = arith.constant 0 : i32
    return %arg1, %c0_i32, %c0_i32_0 : i32, i32, i32
  }
  func.func @transform_13(%arg0: i32, %arg1: i32) -> (i32, i32, i32) {
    %c0_i32 = arith.constant 0 : i32
    %c0_i32_0 = arith.constant 0 : i32
    %c0_i32_1 = arith.constant 0 : i32
    return %arg1, %c0_i32, %c0_i32_0 : i32, i32, i32
  }
  func.func @transform_14(%arg0: i32, %arg1: i32) -> (i32, i32, i32) {
    %c0_i32 = arith.constant 0 : i32
    %c0_i32_0 = arith.constant 0 : i32
    %c0_i32_1 = arith.constant 0 : i32
    return %arg1, %c0_i32, %c0_i32_0 : i32, i32, i32
  }
  func.func @transform_15(%arg0: i32, %arg1: i32) -> (i32, i32, i32) {
    %c0_i32 = arith.constant 0 : i32
    %c0_i32_0 = arith.constant 0 : i32
    %c0_i32_1 = arith.constant 0 : i32
    return %arg1, %c0_i32, %c0_i32_0 : i32, i32, i32
  }
  func.func @transform_16(%arg0: i32, %arg1: i32) -> (i32, i32, i32) {
    %c0_i32 = arith.constant 0 : i32
    %c0_i32_0 = arith.constant 0 : i32
    %c0_i32_1 = arith.constant 0 : i32
    return %arg1, %c0_i32, %c0_i32_0 : i32, i32, i32
  }
  func.func @transform_17(%arg0: i32, %arg1: i32) -> (i32, i32, i32) {
    %c0_i32 = arith.constant 0 : i32
    %c0_i32_0 = arith.constant 0 : i32
    %c0_i32_1 = arith.constant 0 : i32
    return %arg0, %c0_i32, %c0_i32_0 : i32, i32, i32
  }
}

</mosaic_0001>

<bundles_post_ra>
// kernel: tpu_custom_call.1
= control target key start
LH: loop header
LB: loop body
LE: loop exit
PB: predicated region body
PF: predicated region fallthrough
CT: control target
= control target key end

     0   :  { %s3435_s0 = inlined_call_operand.vmem [shape: f32[2,8,4], index: 0, kind: input, shape index: {}]   ;;  %s3436_s1 = inlined_call_operand.vmem [shape: f32[2,1,8], index: 1, kind: input, shape index: {}]   ;;  %s3437_s2 = inlined_call_operand.vmem [shape: bf16[4,32], index: 2, kind: input, shape index: {}]   ;;  %s3438_s3 = inlined_call_operand.vmem [shape: f32[1,32], index: 3, kind: input, shape index: {}]   ;;  %s3439_s4 = inlined_call_operand.vmem [shape: f32[16,32], index: 4, kind: input, shape index: {}]   ;;  %s3440_s5 = inlined_call_operand.vmem [shape: bf16[2,32,96], index: 5, kind: input, shape index: {}]   ;;  %s3441_s6 = inlined_call_operand.vmem [shape: f32[2,1,96], index: 6, kind: input, shape index: {}]   ;;  %s3442_s7 = inlined_call_operand.vmem [shape: bf16[2,32,32], index: 7, kind: input, shape index: {}]   ;;  %s3443_s8 = inlined_call_operand.vmem [shape: f32[2,1,32], index: 8, kind: input, shape index: {}]   ;;  %s3444_s9 = inlined_call_operand.vmem [shape: f32[2,1,32], index: 9, kind: input, shape index: {}]   ;;  %s3445_s10 = inlined_call_operand.vmem [shape: f32[2,1,32], index: 10, kind: input, shape index: {}]   ;;  %s3446_s11 = inlined_call_operand.vmem [shape: bf16[2,32,64], index: 11, kind: input, shape index: {}]   ;;  %s3447_s12 = inlined_call_operand.vmem [shape: f32[2,1,64], index: 12, kind: input, shape index: {}]   ;;  %s3448_s13 = inlined_call_operand.vmem [shape: bf16[2,64,32], index: 13, kind: input, shape index: {}]   ;;  %s3449_s14 = inlined_call_operand.vmem [shape: f32[2,1,32], index: 14, kind: input, shape index: {}]   ;;  %s3450_s15 = inlined_call_operand.vmem [shape: f32[2,1,32], index: 15, kind: input, shape index: {}]   ;;  %s3451_s16 = inlined_call_operand.vmem [shape: f32[2,1,32], index: 16, kind: input, shape index: {}]   ;;  %s3452_s17 = inlined_call_operand.hbm [shape: bf16[2,8,32], index: 17, kind: output, shape index: {}]  }
   0x1   :  { %3460 = sst [smem:[#allocation10_spill]] %s3435_s0 }
   0x2   :  { %3461 = sst [smem:[#allocation11_spill]] %s3436_s1 }
   0x3   :  { %3462 = sst [smem:[#allocation12_spill]] %s3438_s3 }
   0x4   :  { %3463 = sst [smem:[#allocation13_spill]] %s3439_s4 }
   0x5   :  { %3464 = sst [smem:[#allocation14_spill]] %s3440_s5 }
   0x6   :  { %3465 = sst [smem:[#allocation15_spill]] %s3442_s7 }
   0x7   :  { %3466 = sst [smem:[#allocation16_spill]] %s3452_s17 }
   0x8   :  { %22 = vsyncpa [#allocation4], 0  ;;  %s3028_s24 = smov 0   ;;  %s3030_s25 = smov 0  }
   0x9   :  { %s3032_s26 = smov 0  }
   0xa LB: > { %3467 = sst [smem:[#allocation6_spill]] %s2915_s25  ;;  %s37_s28 = sadd.s32 1, %s2915_s25  ;;  %s2919_s26 = sphi %s3032_s26, %s28_s26   ;;  %s2915_s25 = sphi %s3030_s25, %s3488_s25   ;;  %s2911_s24 = sphi %s3028_s24, %s3487_s24  }
   0xb   : > { %3468 = sst [smem:[#allocation7_spill]] %s2919_s26  ;;  %p38_p0 = scmp.ge.s32.totalorder %s37_s28, 2 }
   0xc   : > { %p2495_p1 = scmp.ge.s32.totalorder %s2919_s26, 1  ;;  %p615_p2 = scmp.lt.s32.totalorder %s2919_s26, 3 }
   0xd   : > { %s3490_s28 = smov (%p38_p0, %s37_s28), 0 }
   0xe   : > { %3469 = sst [smem:[#allocation8_spill]] %s3490_s28  ;;  %p616_p3 = pnand %p2495_p1, %p615_p2 }
  0x10   : > { %619 = sbr.rel (%p616_p3) target bundleno = 4751 (0x128f), region = 88 }
  0x17   : > { %p721_p4 = scmp.lt.s32.totalorder %s2911_s24, 1  ;;  %s3470_s5 = sld [smem:[#allocation14_spill]] }
  0x18   : > { %s3471_s7 = sld [smem:[#allocation15_spill]]  ;;  %p2504_p5 = scmp.ne.s32.totalorder %s2911_s24, 0 }
  0x19   : > { %s3051_s29 = scalar_select %p721_p4, %s2911_s24, 1 }
  0x1a   : > { %770 = sbr.rel (%p2504_p5) target bundleno = 256 (0x100), region = 92  ;;  %v774_v0 = vld [vmem:[%s3437_s2] sm:$0x3] (!%p2504_p5)  ;;  %vm786_vm0 = vcmask (!%p2504_p5), 1041408   ;;  %s3473_s28 = sld [smem:[#allocation10_spill]] (!%p2504_p5)  ;;  %v2921_v2 = vmov (!%p2504_p5), 0.0  }
  0x1b   : > { %s2553_s0 = sshll.u32 %s3051_s29, 4  ;;  %s758_s30 = scalar_lea.vmem %s3449_s14, %s3051_s29  ;;  %2610 = vmatprep.subr.bf16.mxu0 (!%p2504_p5), %v2921_v2  ;;  %v788_v3 = vsel (!%p2504_p5), %vm786_vm0, %v774_v0, 0  ;;  %vm2922_vm1 = vmmov (!%p2504_p5), 0   ;;  %vm782_vm2 = vcmask (!%p2504_p5), 31744   ;;  %vm837_vm3 = vcmask (!%p2504_p5), 261120  }
  0x1c   : > { %s761_s1 = scalar_lea.vmem %s3450_s15, %s3051_s29  ;;  %s764_s3 = scalar_lea.vmem %s3451_s16, %s3051_s29  ;;  %2612 = vmatprep.mubr.msk.bf16.mxu0 (!%p2504_p5), %vm2922_vm1, %v2921_v2  ;;  %2611 = vmatpush3.bf16.msra.mxu0 (!%p2504_p5), %v788_v3 }
  0x1d   : > { %s3061_s21 = scalar_lea.vmem %s3470_s5, %s2553_s0  ;;  %s3083_s5 = scalar_lea.vmem %s3446_s11, %s2553_s0 }
  0x1e   : > { %s3066_s27 = scalar_lea.vmem %s3471_s7, %s2553_s0  ;;  %s750_s7 = scalar_lea.vmem %s3447_s12, %s3051_s29 }
  0x1f   : > { %3472 = sst [smem:[#allocation9_spill]] %s3066_s27  ;;  %s2556_s27 = sshll.u32 %s3051_s29, 5 }
  0x20   : > { %s3093_s17 = scalar_lea.vmem %s3448_s13, %s2556_s27  ;;  %v771_v1 = vld [vmem:[%s3473_s28] sm:$0xff] (!%p2504_p5)  ;;  %v772_v4 = vld [vmem:[%s3473_s28 + $0x8] sm:$0xff] (!%p2504_p5)  ;;  %s3474_s0 = sld [smem:[#allocation12_spill]] (!%p2504_p5) }
  0x21   : > { %v773_v5 = vpack.c.bf16 %v772_v4, %v771_v1  ;;  %s3475_s23 = sld [smem:[#allocation13_spill]] }
  0x23   : > { %2613 = vmatmul.mubr.msk.bf16.vlgmr.msra.gmra.mrb[0].mxu0 %vm782_vm2, %v773_v5 }
  0x26   : > { %v2505_v6 = vld [vmem:[%s3474_s0] ss:$0 sm:$0xff] }
  0x27   : > { %v833_v10 = vld [vmem:[%s3475_s23] sm:$0xff]  ;;  %v834_v15 = vld [vmem:[%s3475_s23 + $0x8] sm:$0xff] }
  0xf6   : > { %v824_v7 = vpop.f32.mrb[0].mxu0 }
  0xf7   : > { %v825_v8 = vadd.f32 %v2505_v6, %v824_v7  ;;  %v2614_v9 = vpop.f32.mrb[1].mxu0 }
  0xf8   : > { %v827_v11 = vpop.f32.mrb[2].mxu0 }
  0xf9   : > { %v831_v12 = vmul.f32 5.656854, %v825_v8  ;;  %v828_v13 = vadd.f32 %v2505_v6, %v827_v11  ;;  %v2615_v14 = vpop.f32.mrb[3].mxu0 }
  0xfb   : > { %v835_v16 = vadd.f32 %v833_v10, %v831_v12  ;;  %v832_v17 = vmul.f32 5.656854, %v828_v13 }
  0xfd   : > { %838 = vst.msk [vmem:[#allocation2] sm:$0xff] %vm837_vm3, %v835_v16  ;;  %v836_v18 = vadd.f32 %v834_v15, %v832_v17 }
  0xff   : > { %839 = vst.msk [vmem:[#allocation2 + $0x8] sm:$0xff] %vm837_vm3, %v836_v18 }
 0x100 PF: > { %v2811_v19 = vld [vmem:[%s3061_s21] sm:$0xff]   ;;  %v2923_v20 = vmov 0.0   ;;  %v2812_v21 = vld [vmem:[%s3061_s21 + $0x8] sm:$0xff]   ;;  %vm2924_vm4 = vmmov 0   ;;  %vm866_vm5 = vcmask 261120   ;;  %s3476_s4 = scalar_lea.vmem %s3441_s6, %s3051_s29  ;;  %s2925_s26 = smov 96  }
 0x101   : > { %2616 = vmatprep.subr.bf16.mxu1 %v2923_v20  ;;  %2630 = vmatprep.subr.bf16.mxu0 %v2923_v20  ;;  %v2507_v25 = vld [vmem:[%s3476_s4] ss:$0 sm:$0xff]  ;;  %vm934_vm6 = vcmask 64512   ;;  %s3477_s20 = sld [smem:[#allocation11_spill]]  ;;  %s2926_s25 = smov 64   ;;  %vm1059_vm7 = vcmask 1043456  }
 0x102   : > { %2617 = vmatpush3.bf16.msra.mxu1 %v2811_v19  ;;  %2620 = vmatprep.mubr.msk.bf16.mxu1 %vm2924_vm4, %v2923_v20  ;;  %s2927_s21 = smov 88   ;;  %s2928_s19 = smov 120   ;;  %vm2181_vm8 = vcmask 523264  }
 0x103   : > { %2618 = vmatprep.subr.bf16.mxu1 %v2923_v20  ;;  %2632 = vmatprep.mubr.msk.bf16.mxu0 %vm2924_vm4, %v2923_v20  ;;  %s2929_s4 = smov 56   ;;  %s3478_s18 = sld [smem:[#allocation9_spill]] }
 0x104   : > { %v3132_v22 = vld [vmem:[#allocation2] sm:$0xff]  ;;  %s2931_s0 = smov 80   ;;  %s2932_s22 = smov 48  }
 0x105   : > { %s2933_s27 = smov 72   ;;  %p2548_p6 = scmp.ne.s32.totalorder %s2911_s24, 1 }
 0x106   : > { %v3134_v23 = vld [vmem:[#allocation2 + $0x8] sm:$0xff]  ;;  %2619 = vmatpush3.bf16.msra.mxu1 %v2812_v21  ;;  %vm2290_vm9 = vcmask (!%p2548_p6), 257024  }
 0x107   : > { %v842_v24 = vpack.c.bf16 %v3134_v23, %v3132_v22  ;;  %2624 = vmatprep.subr.bf16.mxu1 %v2923_v20  ;;  %v3171_v38 = vld [vmem:[%s3477_s20] ss:$0 sm:$0xff]  ;;  %v3177_v43 = vld [vmem:[%s3477_s20 + $0x1] ss:$0 sm:$0xff] }
 0x109   : > { %2621 = vmatmul.mubr.msk.bf16.vlgmr.msra.gmra.mrb[0].mxu1 %vm866_vm5, %v842_v24 }
 0x10a   : > { %2626 = vmatprep.mubr.msk.bf16.mxu1 %vm2924_vm4, %v2923_v20 }
 0x1dc   : > { %v904_v26 = vpop.f32.mrb[0].mxu1 }
 0x1dd   : > { %v905_v27 = vadd.f32 %v2507_v25, %v904_v26  ;;  %v2622_v28 = vpop.f32.mrb[1].mxu1 }
 0x1de   : > { %v907_v29 = vpop.f32.mrb[2].mxu1 }
 0x1df   : > { %v3150_v30 = vpack.c.bf16 %v905_v27, %v905_v27  ;;  %v908_v31 = vadd.f32 %v2507_v25, %v907_v29  ;;  %v2623_v32 = vpop.f32.mrb[3].mxu1 }
 0x1e1   : > { %932 = vrot.lane.b32.xlu0 %v3150_v30, %s2925_s26  ;;  %v3153_v33 = vpack.c.bf16 %v908_v31, %v908_v31 }
 0x1e5   : > { %982 = vrot.lane.b32.xlu0 %v3153_v33, %s2925_s26  ;;  %s2930_s26 = smov 112  }
 0x253   : > { %v933_v34 = vpop.permute.xlu0 %932 }
 0x254   : > { %v939_v35 = vsel %vm934_vm6, %v933_v34, 0 }
 0x255   : > { %2625 = vmatpush3.bf16.xpose.msra.mxu1 %v939_v35 }
 0x256   : > { %2636 = vmatprep.subr.bf16.mxu1 %v2923_v20 }
 0x257   : > { %v983_v36 = vpop.permute.xlu0 %982 }
 0x258   : > { %v988_v37 = vsel %vm934_vm6, %v983_v36, 0 }
 0x259   : > { %2631 = vmatpush3.bf16.xpose.msra.mxu0 %v988_v37 }
 0x25a   : > { %2642 = vmatprep.subr.bf16.mxu0 %v2923_v20 }
 0x25c   : > { %2627 = vmatmul.mubr.msk.bf16.vlgmr.msra.gmra.mrb[4].mxu1 %vm934_vm6, %v3150_v30 }
 0x25d   : > { %2638 = vmatprep.mubr.msk.bf16.mxu1 %vm2924_vm4, %v2923_v20 }
 0x260   : > { %2633 = vmatmul.mubr.msk.bf16.vlgmr.msra.gmra.mrb[0].mxu0 %vm934_vm6, %v3153_v33 }
 0x261   : > { %2644 = vmatprep.mubr.msk.bf16.mxu0 %vm2924_vm4, %v2923_v20 }
 0x32f   : > { %v975_v39 = vpop.f32.mrb[4].mxu1 }
 0x330   : > { %v976_v40 = vadd.f32 %v3171_v38, %v975_v39  ;;  %v2628_v41 = vpop.f32.mrb[5].mxu1 }
 0x331   : > { %v978_v42 = vpop.f32.mrb[6].mxu1 }
 0x332   : > { %v2629_v44 = vpop.f32.mrb[7].mxu1  ;;  %v1030_v45 = vsel %vm934_vm6, %v976_v40, -inf }
 0x333   : > { %v1024_v46 = vpop.f32.mrb[0].mxu0  ;;  %1031 = vmax.xlane.f32.xlu1 %v1030_v45 }
 0x334   : > { %v1025_v47 = vadd.f32 %v3177_v43, %v1024_v46  ;;  %v2634_v48 = vpop.f32.mrb[1].mxu0 }
 0x335   : > { %v1027_v49 = vpop.f32.mrb[2].mxu0 }
 0x336   : > { %v2635_v50 = vpop.f32.mrb[3].mxu0  ;;  %v1033_v51 = vsel %vm934_vm6, %v1025_v47, -inf }
 0x337   : > { %1034 = vmax.xlane.f32.xlu1 %v1033_v51 }
 0x348   : > { %1054 = vrot.lane.b32.xlu1 %v3150_v30, %s2926_s25 }
 0x34c   : > { %1103 = vrot.lane.b32.xlu1 %v3153_v33, %s2926_s25 }
 0x350   : > { %1154 = vrot.lane.b32.xlu1 %v3150_v30, %s2927_s21 }
 0x3c0   : > { %v1032_v52 = vpop.xlane.xlu1 %1031 }
 0x3c1   : > { %v1036_v53 = vsub.f32 %v976_v40, %v1032_v52 }
 0x3c3   : > { %v1038_v54 = vmul.f32 1.442695, %v1036_v53 }
 0x3c4   : > { %v1035_v55 = vpop.xlane.xlu1 %1034 }
 0x3c5   : > { %2819 = vpow2.f32 %v1038_v54  ;;  %v1037_v56 = vsub.f32 %v1025_v47, %v1035_v55 }
 0x3c7   : > { %v1040_v57 = vmul.f32 1.442695, %v1037_v56 }
 0x3c8   : > { %v1055_v58 = vpop.permute.xlu1 %1054 }
 0x3c9   : > { %2821 = vpow2.f32 %v1040_v57  ;;  %v1061_v59 = vsel %vm1059_vm7, %v1055_v58, 0 }
 0x3ca   : > { %2637 = vmatpush3.bf16.msra.mxu1 %v1061_v59 }
 0x3cb   : > { %2648 = vmatprep.subr.bf16.mxu1 %v2923_v20 }
 0x3cc   : > { %v1104_v60 = vpop.permute.xlu1 %1103 }
 0x3cd   : > { %v1109_v61 = vsel %vm1059_vm7, %v1104_v60, 0 }
 0x3ce   : > { %2643 = vmatpush3.bf16.msra.mxu0 %v1109_v61  ;;  %v916_v61 = vld [vmem:[%s3478_s18 + $0x4] sm:$0xf] }
 0x3cf   : > { %v2820_v62 = vpop.eup %2819  ;;  %2654 = vmatprep.subr.bf16.mxu0 %v2923_v20 }
 0x3d0   : > { %v1042_v63 = vsel %vm934_vm6, %v2820_v62, 0.0  ;;  %v1155_v2 = vpop.permute.xlu1 %1154 }
 0x3d1   : > { %1043 = vadd.xlane.f32.xlu0 %v1042_v63  ;;  %v1160_v9 = vsel %vm934_vm6, %v1155_v2, 0  ;;  %v915_v2 = vld [vmem:[%s3478_s18] sm:$0xf] }
 0x3d3   : > { %v2822_v0 = vpop.eup %2821 }
 0x3d4   : > { %v1045_v1 = vsel %vm934_vm6, %v2822_v0, 0.0 }
 0x3d5   : > { %1046 = vadd.xlane.f32.xlu1 %v1045_v1 }
 0x3e6   : > { %1204 = vrot.lane.b32.xlu1 %v3153_v33, %s2927_s21  ;;  %s2934_s21 = smov 104  }
 0x3e7   : > { %1152 = vrot.lane.b32.xlu0 %v3150_v30, %s2928_s19 }
 0x3ea   : > { %1202 = vrot.lane.b32.xlu1 %v3153_v33, %s2928_s19  ;;  %s2935_s19 = smov 40  }
 0x45e   : > { %v1044_v3 = vpop.xlane.xlu0 %1043 }
 0x45f   : > { %2823 = vrcp.f32 %v1044_v3 }
 0x462   : > { %v1047_v4 = vpop.xlane.xlu1 %1046  ;;  %v1153_v14 = vpop.permute.xlu0 %1152 }
 0x463   : > { %2825 = vrcp.f32 %v1047_v4 }
 0x466   : > { %v1205_v11 = vpop.permute.xlu1 %1204 }
 0x467   : > { %v1210_v13 = vsel %vm934_vm6, %v1205_v11, 0 }
 0x469   : > { %v2824_v5 = vpop.eup %2823 }
 0x46a   : > { %v1050_v6 = vmul.f32 %v2824_v5, %v2820_v62  ;;  %v1203_v15 = vpop.permute.xlu1 %1202  ;;  %v1424_v5 = vsel %vm1059_vm7, %v915_v2, 0 }
 0x46c   : > { %v1052_v7 = vpack.c.bf16 %v1050_v6, %v1050_v6 }
 0x46d   : > { %v2826_v8 = vpop.eup %2825 }
 0x46e   : > { %v1051_v10 = vmul.f32 %v2826_v8, %v2822_v0  ;;  %2639 = vmatmul.mubr.msk.bf16.vlgmr.msra.gmra.mrb[8].mxu1 %vm934_vm6, %v1052_v7  ;;  %v1377_v0 = vsel %vm1059_vm7, %v916_v61, 0 }
 0x46f   : > { %2649 = vmatpush3.bf16.xpose.msra.mxu1 %v1160_v9  ;;  %2650 = vmatprep.mubr.msk.bf16.mxu1 %vm2924_vm4, %v2923_v20 }
 0x470   : > { %v1053_v12 = vpack.c.bf16 %v1051_v10, %v1051_v10  ;;  %2660 = vmatprep.subr.bf16.mxu1 %v2923_v20 }
 0x472   : > { %2645 = vmatmul.mubr.msk.bf16.vlgmr.msra.gmra.mrb[4].mxu0 %vm934_vm6, %v1053_v12 }
 0x473   : > { %2655 = vmatpush3.bf16.xpose.msra.mxu0 %v1210_v13  ;;  %2656 = vmatprep.mubr.msk.bf16.mxu0 %vm2924_vm4, %v2923_v20 }
 0x474   : > { %2666 = vmatprep.subr.bf16.mxu0 %v2923_v20 }
 0x476   : > { %2651 = vmatmul.mubr.msk.bf16.vlgmr.msra.gmra.mrb[12].mxu1 %vm934_vm6, %v1153_v14 }
 0x477   : > { %2662 = vmatprep.mubr.msk.bf16.mxu1 %vm2924_vm4, %v2923_v20 }
 0x47a   : > { %2657 = vmatmul.mubr.msk.bf16.vlgmr.msra.gmra.mrb[8].mxu0 %vm934_vm6, %v1203_v15 }
 0x47b   : > { %2668 = vmatprep.mubr.msk.bf16.mxu0 %vm2924_vm4, %v2923_v20 }
 0x541   : > { %v3212_v16 = vpop.f32.mrb[8].mxu1 }
 0x542   : > { %v2640_v17 = vpop.f32.mrb[9].mxu1 }
 0x543   : > { %v1100_v18 = vpop.f32.mrb[10].mxu1 }
 0x544   : > { %v2641_v19 = vpop.f32.mrb[11].mxu1 }
 0x545   : > { %v3214_v21 = vpop.f32.mrb[4].mxu0 }
 0x546   : > { %v1151_v24 = vpack.c.bf16 %v3214_v21, %v3212_v16  ;;  %v2646_v25 = vpop.f32.mrb[5].mxu0 }
 0x547   : > { %v1148_v26 = vpop.f32.mrb[6].mxu0 }
 0x548   : > { %v2647_v27 = vpop.f32.mrb[7].mxu0 }
 0x549   : > { %v1196_v28 = vpop.f32.mrb[12].mxu1 }
 0x54a   : > { %v1197_v29 = vadd.f32 %v3171_v38, %v1196_v28  ;;  %v2652_v31 = vpop.f32.mrb[13].mxu1 }
 0x54b   : > { %v1199_v32 = vpop.f32.mrb[14].mxu1 }
 0x54c   : > { %v2653_v34 = vpop.f32.mrb[15].mxu1  ;;  %v1252_v35 = vsel %vm934_vm6, %v1197_v29, -inf }
 0x54d   : > { %v1246_v36 = vpop.f32.mrb[8].mxu0  ;;  %1253 = vmax.xlane.f32.xlu1 %v1252_v35 }
 0x54e   : > { %v1247_v37 = vadd.f32 %v3177_v43, %v1246_v36  ;;  %v2658_v39 = vpop.f32.mrb[9].mxu0 }
 0x54f   : > { %v1249_v40 = vpop.f32.mrb[10].mxu0 }
 0x550   : > { %v2659_v41 = vpop.f32.mrb[11].mxu0  ;;  %v1255_v42 = vsel %vm934_vm6, %v1247_v37, -inf }
 0x551   : > { %1256 = vmax.xlane.f32.xlu0 %v1255_v42 }
 0x567   : > { %1324 = vrot.lane.b32.xlu0 %v3153_v33, %s2929_s4 }
 0x56b   : > { %1467 = vrot.lane.b32.xlu0 %v3150_v30, %s2930_s26 }
 0x5da   : > { %v1254_v44 = vpop.xlane.xlu1 %1253 }
 0x5db   : > { %v1258_v45 = vsub.f32 %v1197_v29, %v1254_v44 }
 0x5dd   : > { %v1260_v46 = vmul.f32 1.442695, %v1258_v45 }
 0x5de   : > { %v1257_v47 = vpop.xlane.xlu0 %1256 }
 0x5df   : > { %2827 = vpow2.f32 %v1260_v46  ;;  %v1259_v48 = vsub.f32 %v1247_v37, %v1257_v47 }
 0x5e1   : > { %v1262_v49 = vmul.f32 1.442695, %v1259_v48 }
 0x5e2   : > { %v1325_v50 = vpop.permute.xlu0 %1324 }
 0x5e3   : > { %2829 = vpow2.f32 %v1262_v49  ;;  %v1330_v51 = vsel %vm1059_vm7, %v1325_v50, 0 }
 0x5e4   : > { %2667 = vmatpush3.bf16.msra.mxu0 %v1330_v51 }
 0x5e5   : > { %2678 = vmatprep.subr.bf16.mxu0 %v2923_v20 }
 0x5e6   : > { %v1468_v25 = vpop.permute.xlu0 %1467 }
 0x5e9   : > { %v2828_v52 = vpop.eup %2827 }
 0x5ea   : > { %v1264_v53 = vsel %vm934_vm6, %v2828_v52, 0.0 }
 0x5eb   : > { %1265 = vadd.xlane.f32.xlu1 %v1264_v53 }
 0x5ed   : > { %v2830_v54 = vpop.eup %2829 }
 0x5ee   : > { %v1267_v55 = vsel %vm934_vm6, %v2830_v54, 0.0 }
 0x5ef   : > { %1268 = vadd.xlane.f32.xlu1 %v1267_v55 }
 0x600   : > { %1276 = vrot.lane.b32.xlu1 %v3150_v30, %s2929_s4 }
 0x604   : > { %1469 = vrot.lane.b32.xlu1 %v3150_v30, %s2931_s0 }
 0x608   : > { %1519 = vrot.lane.b32.xlu1 %v3153_v33, %s2931_s0 }
 0x60c   : > { %1517 = vrot.lane.b32.xlu1 %v3153_v33, %s2930_s26 }
 0x678   : > { %v1266_v56 = vpop.xlane.xlu1 %1265 }
 0x679   : > { %2831 = vrcp.f32 %v1266_v56 }
 0x67c   : > { %v1269_v57 = vpop.xlane.xlu1 %1268 }
 0x67d   : > { %2833 = vrcp.f32 %v1269_v57 }
 0x680   : > { %v1277_v58 = vpop.permute.xlu1 %1276 }
 0x681   : > { %v1282_v59 = vsel %vm1059_vm7, %v1277_v58, 0 }
 0x682   : > { %2661 = vmatpush3.bf16.msra.mxu1 %v1282_v59 }
 0x683   : > { %v2832_v60 = vpop.eup %2831  ;;  %2672 = vmatprep.subr.bf16.mxu1 %v2923_v20 }
 0x684   : > { %v1272_v62 = vmul.f32 %v2832_v60, %v2828_v52  ;;  %v1470_v6 = vpop.permute.xlu1 %1469 }
 0x685   : > { %v1475_v18 = vsel %vm934_vm6, %v1470_v6, 0 }
 0x686   : > { %v1274_v63 = vpack.c.bf16 %v1272_v62, %v1272_v62 }
 0x687   : > { %v2834_v1 = vpop.eup %2833 }
 0x688   : > { %v1273_v3 = vmul.f32 %v2834_v1, %v2830_v54  ;;  %2663 = vmatmul.mubr.msk.bf16.vlgmr.msra.gmra.mrb[16].mxu1 %vm934_vm6, %v1274_v63  ;;  %v1520_v7 = vpop.permute.xlu1 %1519 }
 0x689   : > { %2673 = vmatpush3.bf16.msra.mxu1 %v1377_v0  ;;  %2674 = vmatprep.mubr.msk.bf16.mxu1 %vm2924_vm4, %v2923_v20  ;;  %v1525_v8 = vsel %vm934_vm6, %v1520_v7, 0 }
 0x68a   : > { %v1275_v4 = vpack.c.bf16 %v1273_v3, %v1273_v3  ;;  %2684 = vmatprep.subr.bf16.mxu1 %v2923_v20 }
 0x68c   : > { %2669 = vmatmul.mubr.msk.bf16.vlgmr.msra.gmra.mrb[12].mxu0 %vm934_vm6, %v1275_v4  ;;  %v1518_v9 = vpop.permute.xlu1 %1517 }
 0x68d   : > { %2679 = vmatpush3.bf16.msra.mxu0 %v1424_v5  ;;  %2680 = vmatprep.mubr.msk.bf16.mxu0 %vm2924_vm4, %v2923_v20 }
 0x68e   : > { %2690 = vmatprep.subr.bf16.mxu0 %v2923_v20 }
 0x694   : > { %2681 = vmatmul.mubr.msk.bf16.vlgmr.msra.gmra.mrb[16].mxu0 %vm934_vm6, %v1151_v24 }
 0x695   : > { %2692 = vmatprep.mubr.msk.bf16.mxu0 %vm2924_vm4, %v2923_v20 }
 0x696   : > { %2691 = vmatpush3.bf16.xpose.msra.mxu0 %v1525_v8 }
 0x697   : > { %2702 = vmatprep.subr.bf16.mxu0 %v2923_v20 }
 0x69d   : > { %2693 = vmatmul.mubr.msk.bf16.vlgmr.msra.gmra.mrb[20].mxu0 %vm934_vm6, %v1518_v9 }
 0x69e   : > { %2704 = vmatprep.mubr.msk.bf16.mxu0 %vm2924_vm4, %v2923_v20 }
 0x75b   : > { %v1318_v10 = vpop.f32.mrb[16].mxu1 }
 0x75c   : > { %v2664_v11 = vpop.f32.mrb[17].mxu1 }
 0x75d   : > { %v1321_v12 = vpop.f32.mrb[18].mxu1  ;;  %v917_v11 = vld [vmem:[%s3478_s18 + $0x8] sm:$0xf] }
 0x75e   : > { %v2665_v13 = vpop.f32.mrb[19].mxu1  ;;  %v1692_v12 = vsel %vm1059_vm7, %v917_v11, 0 }
 0x75f   : > { %v1366_v14 = vpop.f32.mrb[12].mxu0 }
 0x760   : > { %v1372_v15 = vpack.c.bf16 %v1366_v14, %v1318_v10  ;;  %v2670_v16 = vpop.f32.mrb[13].mxu0 }
 0x761   : > { %v1369_v17 = vpop.f32.mrb[14].mxu0 }
 0x762   : > { %v2671_v19 = vpop.f32.mrb[15].mxu0  ;;  %2675 = vmatmul.mubr.msk.bf16.vlgmr.msra.gmra.mrb[20].mxu1 %vm934_vm6, %v1372_v15 }
 0x763   : > { %2685 = vmatpush3.bf16.xpose.msra.mxu1 %v1475_v18  ;;  %2686 = vmatprep.mubr.msk.bf16.mxu1 %vm2924_vm4, %v2923_v20 }
 0x764   : > { %2696 = vmatprep.subr.bf16.mxu1 %v2923_v20 }
 0x767   : > { %v1460_v21 = vpop.f32.mrb[16].mxu0 }
 0x768   : > { %v2682_v24 = vpop.f32.mrb[17].mxu0 }
 0x769   : > { %v1463_v26 = vpop.f32.mrb[18].mxu0 }
 0x76a   : > { %v2683_v27 = vpop.f32.mrb[19].mxu0  ;;  %2687 = vmatmul.mubr.msk.bf16.vlgmr.msra.gmra.mrb[24].mxu1 %vm934_vm6, %v1468_v25 }
 0x76b   : > { %2698 = vmatprep.mubr.msk.bf16.mxu1 %vm2924_vm4, %v2923_v20 }
 0x770   : > { %v1561_v28 = vpop.f32.mrb[20].mxu0 }
 0x771   : > { %v1562_v29 = vadd.f32 %v3177_v43, %v1561_v28  ;;  %v2694_v31 = vpop.f32.mrb[21].mxu0 }
 0x772   : > { %v1564_v32 = vpop.f32.mrb[22].mxu0 }
 0x773   : > { %v2695_v34 = vpop.f32.mrb[23].mxu0  ;;  %v1570_v35 = vsel %vm934_vm6, %v1562_v29, -inf }
 0x774   : > { %1571 = vmax.xlane.f32.xlu1 %v1570_v35 }
 0x785   : > { %1591 = vrot.lane.b32.xlu1 %v3150_v30, %s2932_s22 }
 0x789   : > { %1739 = vrot.lane.b32.xlu1 %v3150_v30, %s2933_s27 }
 0x78d   : > { %1789 = vrot.lane.b32.xlu1 %v3153_v33, %s2933_s27  ;;  %s3480_s27 = scalar_lea.vmem %s3444_s9, %s3051_s29 }
 0x791   : > { %1787 = vrot.lane.b32.xlu1 %v3153_v33, %s2934_s21 }
 0x801   : > { %v1572_v36 = vpop.xlane.xlu1 %1571 }
 0x802   : > { %v1574_v40 = vsub.f32 %v1562_v29, %v1572_v36 }
 0x804   : > { %v1577_v41 = vmul.f32 1.442695, %v1574_v40 }
 0x805   : > { %v1592_v37 = vpop.permute.xlu1 %1591 }
 0x806   : > { %v1597_v39 = vsel %vm1059_vm7, %v1592_v37, 0  ;;  %2835 = vpow2.f32 %v1577_v41 }
 0x807   : > { %2697 = vmatpush3.bf16.msra.mxu1 %v1597_v39 }
 0x808   : > { %2708 = vmatprep.subr.bf16.mxu1 %v2923_v20 }
 0x809   : > { %v1740_v6 = vpop.permute.xlu1 %1739 }
 0x80a   : > { %v1745_v8 = vsel %vm934_vm6, %v1740_v6, 0 }
 0x80d   : > { %v1790_v17 = vpop.permute.xlu1 %1789 }
 0x80e   : > { %v1795_v25 = vsel %vm934_vm6, %v1790_v17, 0 }
 0x810   : > { %v2836_v55 = vpop.eup %2835 }
 0x811   : > { %v1582_v56 = vsel %vm934_vm6, %v2836_v55, 0.0  ;;  %v1788_v35 = vpop.permute.xlu1 %1787 }
 0x835   : > { %v1413_v42 = vpop.f32.mrb[20].mxu1 }
 0x836   : > { %v3275_v44 = vadd.f32 %v1460_v21, %v1413_v42  ;;  %v2676_v45 = vpop.f32.mrb[21].mxu1 }
 0x837   : > { %v1416_v46 = vpop.f32.mrb[22].mxu1 }
 0x838   : > { %v3277_v47 = vadd.f32 %v1463_v26, %v1416_v46  ;;  %v2677_v48 = vpop.f32.mrb[23].mxu1 }
 0x83d   : > { %v1511_v49 = vpop.f32.mrb[24].mxu1 }
 0x83e   : > { %v1512_v50 = vadd.f32 %v3171_v38, %v1511_v49  ;;  %v2688_v51 = vpop.f32.mrb[25].mxu1 }
 0x83f   : > { %v1514_v52 = vpop.f32.mrb[26].mxu1 }
 0x840   : > { %v2689_v53 = vpop.f32.mrb[27].mxu1  ;;  %v1567_v54 = vsel %vm934_vm6, %v1512_v50, -inf }
 0x841   : > { %1568 = vmax.xlane.f32.xlu0 %v1567_v54 }
 0x845   : > { %1583 = vadd.xlane.f32.xlu0 %v1582_v56 }
 0x8ce   : > { %v1569_v57 = vpop.xlane.xlu0 %1568 }
 0x8cf   : > { %v1573_v58 = vsub.f32 %v1512_v50, %v1569_v57 }
 0x8d1   : > { %v1575_v59 = vmul.f32 1.442695, %v1573_v58 }
 0x8d2   : > { %v1584_v62 = vpop.xlane.xlu0 %1583 }
 0x8d3   : > { %2837 = vpow2.f32 %v1575_v59 }
 0x8d4   : > { %2839 = vrcp.f32 %v1584_v62 }
 0x8dd   : > { %v2838_v60 = vpop.eup %2837 }
 0x8de   : > { %v1579_v61 = vsel %vm934_vm6, %v2838_v60, 0.0  ;;  %v2840_v63 = vpop.eup %2839 }
 0x8df   : > { %1580 = vadd.xlane.f32.xlu0 %v1579_v61  ;;  %v1588_v1 = vmul.f32 %v2840_v63, %v2836_v55  ;;  %v918_v63 = vld [vmem:[%s3478_s18 + $0xc] sm:$0xf]  ;;  %s3479_s18 = scalar_lea.vmem %s3443_s8, %s3051_s29 }
 0x8e1   : > { %v1590_v4 = vpack.c.bf16 %v1588_v1, %v1588_v1 }
 0x8f5   : > { %1639 = vrot.lane.b32.xlu0 %v3153_v33, %s2932_s22 }
 0x8f9   : > { %1737 = vrot.lane.b32.xlu0 %v3150_v30, %s2934_s21 }
 0x96c   : > { %v1581_v0 = vpop.xlane.xlu0 %1580 }
 0x96d   : > { %2841 = vrcp.f32 %v1581_v0  ;;  %v1962_v0 = vsel %vm1059_vm7, %v918_v63, 0  ;;  %v2536_v63 = vld [vmem:[%s750_s7] ss:$0 sm:$0xff] }
 0x970   : > { %v1640_v2 = vpop.permute.xlu0 %1639 }
 0x971   : > { %v1645_v3 = vsel %vm1059_vm7, %v1640_v2, 0 }
 0x972   : > { %2703 = vmatpush3.bf16.msra.mxu0 %v1645_v3 }
 0x973   : > { %2714 = vmatprep.subr.bf16.mxu0 %v2923_v20 }
 0x974   : > { %v1738_v10 = vpop.permute.xlu0 %1737 }
 0x975   : > { %2705 = vmatmul.mubr.msk.bf16.vlgmr.msra.gmra.mrb[24].mxu0 %vm934_vm6, %v1590_v4 }
 0x976   : > { %2716 = vmatprep.mubr.msk.bf16.mxu0 %vm2924_vm4, %v2923_v20 }
 0x977   : > { %v2842_v5 = vpop.eup %2841 }
 0x978   : > { %v1587_v7 = vmul.f32 %v2842_v5, %v2838_v60 }
 0x97a   : > { %v1589_v9 = vpack.c.bf16 %v1587_v7, %v1587_v7 }
 0x97b   : > { %2715 = vmatpush3.bf16.xpose.msra.mxu0 %v1745_v8 }
 0x97c   : > { %2699 = vmatmul.mubr.msk.bf16.vlgmr.msra.gmra.mrb[28].mxu1 %vm934_vm6, %v1589_v9  ;;  %2726 = vmatprep.subr.bf16.mxu0 %v2923_v20 }
 0x97d   : > { %2710 = vmatprep.mubr.msk.bf16.mxu1 %vm2924_vm4, %v2923_v20  ;;  %2709 = vmatpush3.bf16.msra.mxu1 %v1692_v12 }
 0x97e   : > { %2720 = vmatprep.subr.bf16.mxu1 %v2923_v20 }
 0x982   : > { %2717 = vmatmul.mubr.msk.bf16.vlgmr.msra.gmra.mrb[28].mxu0 %vm934_vm6, %v1738_v10 }
 0x983   : > { %2728 = vmatprep.mubr.msk.bf16.mxu0 %vm2924_vm4, %v2923_v20 }
 0xa48   : > { %v1681_v13 = vpop.f32.mrb[24].mxu0 }
 0xa49   : > { %v2706_v14 = vpop.f32.mrb[25].mxu0 }
 0xa4a   : > { %v1684_v15 = vpop.f32.mrb[26].mxu0 }
 0xa4b   : > { %v2707_v16 = vpop.f32.mrb[27].mxu0 }
 0xa4c   : > { %v2533_v16 = vld [vmem:[%s3479_s18] ss:$0 sm:$0xff] }
 0xa4f   : > { %v1633_v18 = vpop.f32.mrb[28].mxu1 }
 0xa50   : > { %v1687_v19 = vpack.c.bf16 %v1681_v13, %v1633_v18  ;;  %v2700_v21 = vpop.f32.mrb[29].mxu1 }
 0xa51   : > { %v1636_v24 = vpop.f32.mrb[30].mxu1 }
 0xa52   : > { %v2701_v26 = vpop.f32.mrb[31].mxu1  ;;  %2711 = vmatmul.mubr.msk.bf16.vlgmr.msra.gmra.mrb[32].mxu1 %vm934_vm6, %v1687_v19 }
 0xa53   : > { %2721 = vmatpush3.bf16.xpose.msra.mxu1 %v1795_v25  ;;  %2722 = vmatprep.mubr.msk.bf16.mxu1 %vm2924_vm4, %v2923_v20 }
 0xa54   : > { %2732 = vmatprep.subr.bf16.mxu1 %v2923_v20 }
 0xa55   : > { %v1781_v27 = vpop.f32.mrb[28].mxu0 }
 0xa56   : > { %v1782_v28 = vadd.f32 %v3171_v38, %v1781_v27  ;;  %v2718_v29 = vpop.f32.mrb[29].mxu0 }
 0xa57   : > { %v1784_v31 = vpop.f32.mrb[30].mxu0 }
 0xa58   : > { %v2719_v32 = vpop.f32.mrb[31].mxu0  ;;  %v1837_v34 = vsel %vm934_vm6, %v1782_v28, -inf }
 0xa59   : > { %1838 = vmax.xlane.f32.xlu0 %v1837_v34 }
 0xa5a   : > { %2723 = vmatmul.mubr.msk.bf16.vlgmr.msra.gmra.mrb[36].mxu1 %vm934_vm6, %v1788_v35 }
 0xa5b   : > { %2734 = vmatprep.mubr.msk.bf16.mxu1 %vm2924_vm4, %v2923_v20 }
 0xae6   : > { %v1839_v36 = vpop.xlane.xlu0 %1838 }
 0xae7   : > { %v1843_v37 = vsub.f32 %v1782_v28, %v1839_v36 }
 0xae9   : > { %v1845_v39 = vmul.f32 1.442695, %v1843_v37 }
 0xaeb   : > { %2843 = vpow2.f32 %v1845_v39 }
 0xaf5   : > { %v2844_v40 = vpop.eup %2843 }
 0xaf6   : > { %v1849_v41 = vsel %vm934_vm6, %v2844_v40, 0.0 }
 0xaf7   : > { %1850 = vadd.xlane.f32.xlu0 %v1849_v41 }
 0xb25   : > { %v1728_v38 = vpop.f32.mrb[32].mxu1 }
 0xb26   : > { %v1735_v42 = vadd.f32 %v1728_v38, %v3275_v44  ;;  %v2712_v45 = vpop.f32.mrb[33].mxu1 }
 0xb27   : > { %v1731_v46 = vpop.f32.mrb[34].mxu1 }
 0xb28   : > { %v1736_v48 = vadd.f32 %v1731_v46, %v3277_v47  ;;  %v2713_v49 = vpop.f32.mrb[35].mxu1 }
 0xb2d   : > { %v1831_v50 = vpop.f32.mrb[36].mxu1 }
 0xb2e   : > { %v1832_v51 = vadd.f32 %v3177_v43, %v1831_v50  ;;  %v2724_v52 = vpop.f32.mrb[37].mxu1 }
 0xb2f   : > { %v1834_v53 = vpop.f32.mrb[38].mxu1 }
 0xb30   : > { %v2725_v54 = vpop.f32.mrb[39].mxu1  ;;  %v1840_v55 = vsel %vm934_vm6, %v1832_v51, -inf  ;;  %v2534_v53 = vld [vmem:[%s3480_s27] ss:$0 sm:$0xff] }
 0xb31   : > { %1841 = vmax.xlane.f32.xlu1 %v1840_v55 }
 0xb42   : > { %1861 = vrot.lane.b32.xlu1 %v3150_v30, %s2935_s19 }
 0xb84   : > { %v1851_v56 = vpop.xlane.xlu0 %1850 }
 0xb85   : > { %2845 = vrcp.f32 %v1851_v56 }
 0xb8f   : > { %v2846_v44 = vpop.eup %2845 }
 0xb90   : > { %v1857_v47 = vmul.f32 %v2846_v44, %v2844_v40 }
 0xb92   : > { %v1859_v61 = vpack.c.bf16 %v1857_v47, %v1857_v47 }
 0xbbe   : > { %v1842_v57 = vpop.xlane.xlu1 %1841 }
 0xbbf   : > { %v1844_v58 = vsub.f32 %v1832_v51, %v1842_v57 }
 0xbc1   : > { %v1847_v59 = vmul.f32 1.442695, %v1844_v58 }
 0xbc2   : > { %v1862_v60 = vpop.permute.xlu1 %1861 }
 0xbc3   : > { %2847 = vpow2.f32 %v1847_v59  ;;  %v1867_v43 = vsel %vm1059_vm7, %v1862_v60, 0 }
 0xbc4   : > { %2727 = vmatpush3.bf16.msra.mxu0 %v1867_v43  ;;  %v2815_v43 = vld [vmem:[%s3093_s17] sm:$0xff]  }
 0xbc5   : > { %2738 = vmatprep.subr.bf16.mxu0 %v2923_v20 }
 0xbc7   : > { %2729 = vmatmul.mubr.msk.bf16.vlgmr.msra.gmra.mrb[32].mxu0 %vm934_vm6, %v1859_v61  ;;  %v2816_v61 = vld [vmem:[%s3093_s17 + $0x8] sm:$0xff]  }
 0xbc8   : > { %2740 = vmatprep.mubr.msk.bf16.mxu0 %vm2924_vm4, %v2923_v20  ;;  %2739 = vmatpush3.bf16.msra.mxu0 %v1962_v0 }
 0xbc9   : > { %2752 = vmatprep.subr.bf16.mxu0 %v2923_v20 }
 0xbcd   : > { %v2848_v30 = vpop.eup %2847 }
 0xbce   : > { %v1852_v62 = vsel %vm934_vm6, %v2848_v30, 0.0 }
 0xbcf   : > { %1853 = vadd.xlane.f32.xlu0 %v1852_v62  ;;  %v2818_v62 = vld [vmem:[%s3093_s17 + $0x18] sm:$0xff]  }
 0xbe5   : > { %1909 = vrot.lane.b32.xlu0 %v3153_v33, %s2935_s19  ;;  %s3481_s19 = scalar_lea.vmem %s3445_s10, %s3051_s29 }
 0xbe6   : > { %v2535_v57 = vld [vmem:[%s3481_s19] ss:$0 sm:$0xff] }
 0xc5c   : > { %v1854_v1 = vpop.xlane.xlu0 %1853 }
 0xc5d   : > { %2849 = vrcp.f32 %v1854_v1 }
 0xc60   : > { %v1910_v2 = vpop.permute.xlu0 %1909 }
 0xc61   : > { %v1915_v3 = vsel %vm1059_vm7, %v1910_v2, 0 }
 0xc62   : > { %2733 = vmatpush3.bf16.msra.mxu1 %v1915_v3 }
 0xc63   : > { %2744 = vmatprep.subr.bf16.mxu1 %v2923_v20 }
 0xc67   : > { %v2850_v4 = vpop.eup %2849 }
 0xc68   : > { %v1858_v5 = vmul.f32 %v2850_v4, %v2848_v30  ;;  %v2817_v30 = vld [vmem:[%s3093_s17 + $0x10] sm:$0xff]  }
 0xc6a   : > { %v1860_v6 = vpack.c.bf16 %v1858_v5, %v1858_v5 }
 0xc6c   : > { %2735 = vmatmul.mubr.msk.bf16.vlgmr.msra.gmra.mrb[40].mxu1 %vm934_vm6, %v1860_v6 }
 0xc6d   : > { %2748 = vmatprep.mubr.msk.bf16.mxu1 %vm2924_vm4, %v2923_v20 }
 0xc9a   : > { %v1903_v33 = vpop.f32.mrb[32].mxu0 }
 0xc9b   : > { %v2730_v7 = vpop.f32.mrb[33].mxu0 }
 0xc9c   : > { %v1906_v8 = vpop.f32.mrb[34].mxu0 }
 0xc9d   : > { %v2731_v9 = vpop.f32.mrb[35].mxu0 }
 0xd3f   : > { %v1951_v10 = vpop.f32.mrb[40].mxu1 }
 0xd40   : > { %v1957_v11 = vpack.c.bf16 %v1951_v10, %v1903_v33  ;;  %v2736_v12 = vpop.f32.mrb[41].mxu1 }
 0xd41   : > { %v1954_v13 = vpop.f32.mrb[42].mxu1 }
 0xd42   : > { %v2737_v14 = vpop.f32.mrb[43].mxu1  ;;  %2741 = vmatmul.mubr.msk.bf16.vlgmr.msra.gmra.mrb[36].mxu0 %vm934_vm6, %v1957_v11 }
 0xd43   : > { %2760 = vmatprep.mubr.msk.bf16.mxu0 %vm2924_vm4, %v2923_v20  ;;  %2753 = vmatpush3.bf16.msra.mxu0 %v2815_v43 }
 0xd44   : > { %2754 = vmatprep.subr.bf16.mxu0 %v2923_v20 }
 0xd47   : > { %2755 = vmatpush3.bf16.msra.mxu0 %v2816_v61 }
 0xd48   : > { %2756 = vmatprep.subr.bf16.mxu0 %v2923_v20 }
 0xd4b   : > { %2757 = vmatpush3.bf16.msra.mxu0 %v2817_v30 }
 0xd4c   : > { %2758 = vmatprep.subr.bf16.mxu0 %v2923_v20 }
 0xd4f   : > { %2759 = vmatpush3.bf16.msra.mxu0 %v2818_v62 }
 0xe15   : > { %v1998_v15 = vpop.f32.mrb[36].mxu0 }
 0xe16   : > { %v2005_v17 = vadd.f32 %v1998_v15, %v1735_v42  ;;  %v2742_v18 = vpop.f32.mrb[37].mxu0  ;;  %v2814_v42 = vld [vmem:[%s3083_s5 + $0x8] sm:$0xff]   ;;  %v2540_v15 = vld [vmem:[%s758_s30] ss:$0 sm:$0xff] }
 0xe17   : > { %v2001_v19 = vpop.f32.mrb[38].mxu0 }
 0xe18   : > { %v2014_v21 = vadd.f32 %v2533_v16, %v2005_v17  ;;  %v2006_v24 = vadd.f32 %v2001_v19, %v1736_v48  ;;  %v2743_v25 = vpop.f32.mrb[39].mxu0 }
 0xe1a   : > { %v2015_v26 = vadd.f32 %v2533_v16, %v2006_v24  ;;  %v2016_v27 = vadd.f32 %v2014_v21, %v3132_v22 }
 0xe1c   : > { %v2018_v28 = vsel %vm866_vm5, %v2016_v27, 0.0  ;;  %v2017_v29 = vadd.f32 %v2015_v26, %v3134_v23  ;;  %v2813_v23 = vld [vmem:[%s3083_s5] sm:$0xff]  }
 0xe1d   : > { %2019 = vadd.xlane.f32.xlu1 %v2018_v28  ;;  %2745 = vmatpush3.bf16.msra.mxu1 %v2813_v23 }
 0xe1e   : > { %v2021_v31 = vsel %vm866_vm5, %v2017_v29, 0.0  ;;  %2746 = vmatprep.subr.bf16.mxu1 %v2923_v20 }
 0xe1f   : > { %2022 = vadd.xlane.f32.xlu0 %v2021_v31 }
 0xe21   : > { %2747 = vmatpush3.bf16.msra.mxu1 %v2814_v42 }
 0xeaa   : > { %v2020_v32 = vpop.xlane.xlu1 %2019 }
 0xeab   : > { %v2025_v34 = vmul.f32 0.03125, %v2020_v32 }
 0xeac   : > { %v2023_v35 = vpop.xlane.xlu0 %2022 }
 0xead   : > { %v2027_v36 = vsub.f32 %v2016_v27, %v2025_v34  ;;  %v2026_v37 = vmul.f32 0.03125, %v2023_v35 }
 0xeaf   : > { %v2028_v39 = vsub.f32 %v2017_v29, %v2026_v37  ;;  %v2029_v40 = vmul.f32 %v2027_v36, %v2027_v36 }
 0xeb1   : > { %v2031_v41 = vsel %vm866_vm5, %v2029_v40, 0.0  ;;  %v2030_v22 = vmul.f32 %v2028_v39, %v2028_v39 }
 0xeb2   : > { %2032 = vadd.xlane.f32.xlu1 %v2031_v41 }
 0xeb3   : > { %v2034_v38 = vsel %vm866_vm5, %v2030_v22, 0.0 }
 0xeb4   : > { %2035 = vadd.xlane.f32.xlu0 %v2034_v38 }
 0xf3f   : > { %v2033_v45 = vpop.xlane.xlu1 %2032 }
 0xf40   : > { %v2037_v46 = vmul.f32 0.03125, %v2033_v45 }
 0xf41   : > { %v2036_v48 = vpop.xlane.xlu0 %2035 }
 0xf42   : > { %v2039_v49 = vadd.f32 1e-05, %v2037_v46  ;;  %v2038_v50 = vmul.f32 0.03125, %v2036_v48 }
 0xf44   : > { %2851 = vrsqrt.f32 %v2039_v49  ;;  %v2040_v51 = vadd.f32 1e-05, %v2038_v50  ;;  %v2546_v49 = vld [vmem:[%s761_s1] ss:$0 sm:$0xff] }
 0xf46   : > { %2853 = vrsqrt.f32 %v2040_v51 }
 0xf4e   : > { %v2852_v52 = vpop.eup %2851 }
 0xf4f   : > { %v2043_v54 = vmul.f32 %v2852_v52, %v2027_v36  ;;  %v2547_v52 = vld [vmem:[%s764_s3] ss:$0 sm:$0xff] }
 0xf50   : > { %v2854_v55 = vpop.eup %2853 }
 0xf51   : > { %v2052_v56 = vmul.f32 %v2534_v53, %v2043_v54  ;;  %v2044_v44 = vmul.f32 %v2854_v55, %v2028_v39 }
 0xf53   : > { %v2053_v58 = vmul.f32 %v2534_v53, %v2044_v44  ;;  %v2061_v47 = vadd.f32 %v2535_v57, %v2052_v56 }
 0xf55   : > { %v2062_v59 = vadd.f32 %v2535_v57, %v2053_v58 }
 0xf57   : > { %v2063_v60 = vpack.c.bf16 %v2062_v59, %v2061_v47 }
 0xf59   : > { %2749 = vmatmul.mubr.msk.bf16.vlgmr.msra.gmra.mrb[44].mxu1 %vm866_vm5, %v2063_v60 }
0x102c   : > { %v2124_v0 = vpop.f32.mrb[44].mxu1 }
0x102d   : > { %v2125_v1 = vadd.f32 %v2536_v63, %v2124_v0  ;;  %v2750_v2 = vpop.f32.mrb[45].mxu1 }
0x102e   : > { %v2127_v3 = vpop.f32.mrb[46].mxu1 }
0x102f   : > { %v2133_v4 = vmul.f32 0.70710677, %v2125_v1  ;;  %v2128_v5 = vadd.f32 %v2536_v63, %v2127_v3  ;;  %v2751_v6 = vpop.f32.mrb[47].mxu1  ;;  %v2131_v9 = vmul.f32 0.5, %v2125_v1 }
0x1031   : > { %2855 = verf.f32 %v2133_v4  ;;  %v2134_v33 = vmul.f32 0.70710677, %v2128_v5  ;;  %v2132_v10 = vmul.f32 0.5, %v2128_v5 }
0x1033   : > { %2857 = verf.f32 %v2134_v33 }
0x103b   : > { %v2856_v7 = vpop.eup %2855 }
0x103c   : > { %v2137_v20 = vadd.f32 1.0, %v2856_v7 }
0x103d   : > { %v2858_v8 = vpop.eup %2857 }
0x103e   : > { %v2138_v11 = vadd.f32 1.0, %v2858_v8  ;;  %v2139_v12 = vmul.f32 %v2137_v20, %v2131_v9 }
0x1040   : > { %v2140_v13 = vmul.f32 %v2138_v11, %v2132_v10 }
0x1042   : > { %v2141_v14 = vpack.c.bf16 %v2140_v13, %v2139_v12 }
0x1044   : > { %2761 = vmatmul.mubr.msk.bf16.vlgmr.msra.gmra.mrb[40].mxu0 %vm2181_vm8, %v2141_v14 }
0x1117   : > { %v2219_v16 = vpop.f32.mrb[40].mxu0 }
0x1118   : > { %v2220_v17 = vadd.f32 %v2540_v15, %v2219_v16  ;;  %v2762_v18 = vpop.f32.mrb[41].mxu0 }
0x1119   : > { %v2222_v19 = vpop.f32.mrb[42].mxu0 }
0x111a   : > { %v2223_v21 = vadd.f32 %v2540_v15, %v2222_v19  ;;  %v2763_v24 = vpop.f32.mrb[43].mxu0  ;;  %v2226_v25 = vadd.f32 %v2220_v17, %v2061_v47 }
0x111c   : > { %v2228_v26 = vsel %vm866_vm5, %v2226_v25, 0.0  ;;  %v2227_v27 = vadd.f32 %v2223_v21, %v2062_v59 }
0x111d   : > { %2229 = vadd.xlane.f32.xlu1 %v2228_v26 }
0x111e   : > { %v2231_v28 = vsel %vm866_vm5, %v2227_v27, 0.0 }
0x111f   : > { %2232 = vadd.xlane.f32.xlu0 %v2231_v28 }
0x11aa   : > { %v2230_v29 = vpop.xlane.xlu1 %2229 }
0x11ab   : > { %v2234_v31 = vmul.f32 0.03125, %v2230_v29 }
0x11ac   : > { %v2233_v32 = vpop.xlane.xlu0 %2232 }
0x11ad   : > { %v2236_v34 = vsub.f32 %v2226_v25, %v2234_v31  ;;  %v2235_v35 = vmul.f32 0.03125, %v2233_v32 }
0x11af   : > { %v2237_v36 = vsub.f32 %v2227_v27, %v2235_v35  ;;  %v2238_v37 = vmul.f32 %v2236_v34, %v2236_v34 }
0x11b1   : > { %v2240_v39 = vsel %vm866_vm5, %v2238_v37, 0.0  ;;  %v2239_v40 = vmul.f32 %v2237_v36, %v2237_v36 }
0x11b2   : > { %2241 = vadd.xlane.f32.xlu1 %v2240_v39 }
0x11b3   : > { %v2243_v41 = vsel %vm866_vm5, %v2239_v40, 0.0 }
0x11b4   : > { %2244 = vadd.xlane.f32.xlu0 %v2243_v41 }
0x123f   : > { %v2242_v22 = vpop.xlane.xlu1 %2241 }
0x1240   : > { %v2246_v38 = vmul.f32 0.03125, %v2242_v22 }
0x1241   : > { %v2245_v23 = vpop.xlane.xlu0 %2244 }
0x1242   : > { %v2248_v42 = vadd.f32 1e-05, %v2246_v38  ;;  %v2247_v45 = vmul.f32 0.03125, %v2245_v23 }
0x1244   : > { %2859 = vrsqrt.f32 %v2248_v42  ;;  %v2249_v46 = vadd.f32 1e-05, %v2247_v45 }
0x1246   : > { %2861 = vrsqrt.f32 %v2249_v46 }
0x124e   : > { %v2860_v48 = vpop.eup %2859 }
0x124f   : > { %v2252_v50 = vmul.f32 %v2860_v48, %v2236_v34 }
0x1250   : > { %v2862_v51 = vpop.eup %2861 }
0x1251   : > { %v2261_v53 = vmul.f32 %v2546_v49, %v2252_v50  ;;  %v2253_v54 = vmul.f32 %v2862_v51, %v2237_v36  ;;  %2277 = sbr.rel (%p2548_p6) target bundleno = 4715 (0x126b), region = 96 }
0x1253   : > { %v2270_v55 = vadd.f32 %v2547_v52, %v2261_v53  ;;  %v2262_v56 = vmul.f32 %v2546_v49, %v2253_v54 }
0x1255   : > { %2272 = vst.msk [vmem:[#allocation2] sm:$0xff] %vm866_vm5, %v2270_v55  ;;  %v2271_v44 = vadd.f32 %v2547_v52, %v2262_v56  ;;  %v2280_v57 = vmul.f32 (!%p2548_p6), 0.70710677, %v2270_v55  ;;  %v2278_v47 = vmul.f32 (!%p2548_p6), 0.5, %v2270_v55 }
0x1257   : > { %2273 = vst.msk [vmem:[#allocation2 + $0x8] sm:$0xff] %vm866_vm5, %v2271_v44  ;;  %v2281_v58 = vmul.f32 (!%p2548_p6), 0.70710677, %v2271_v44  ;;  %2863 = verf.f32 (!%p2548_p6), %v2280_v57  ;;  %v2279_v60 = vmul.f32 (!%p2548_p6), 0.5, %v2271_v44 }
0x1259   : > { %2865 = verf.f32 %v2281_v58 }
0x1261   : > { %v2864_v59 = vpop.eup %2863 }
0x1262   : > { %v2284_v61 = vadd.f32 1.0, %v2864_v59 }
0x1263   : > { %v2866_v43 = vpop.eup %2865 }
0x1264   : > { %v2285_v30 = vadd.f32 1.0, %v2866_v43  ;;  %v2286_v62 = vmul.f32 %v2284_v61, %v2278_v47 }
0x1266   : > { %v2287_v63 = vmul.f32 %v2285_v30, %v2279_v60  ;;  %v2288_v0 = vpack.c.bf16 %v2286_v62, %v2286_v62 }
0x1268   : > { %v2289_v1 = vpack.c.bf16 %v2287_v63, %v2287_v63  ;;  %2291 = vst.msk [vmem:[#allocation3] sm:$0xf] %vm2290_vm9, %v2288_v0 }
0x126a   : > { %2292 = vst.msk [vmem:[#allocation3 + $0x4] sm:$0xf] %vm2290_vm9, %v2289_v1 }
0x126b PF: > { %s3482_s3 = sld [smem:[#allocation7_spill]]  ;;  %s2936_s1 = smov [#allocation3]  }
0x126c   : > { %s2302_s27 = sshll.u32 %s2936_s1, 4  ;;  %s2303_s27 = int_to_ptr.vmem [resolvable:$true] %s2302_s27 }
0x126d   : > { %s2867_s5 = scalar_lea.vmem %s2303_s27, 128  ;;  %p2874_p11 = scmp.lt.s32.totalorder %s2303_s27, %s2303_s27 }
0x126e   : > { %p2868_p8 = scmp.ne.s32.totalorder %s2303_s27, %s2867_s5  ;;  %p2875_p12 = scmp.lt.s32.totalorder %s2867_s5, %s2867_s5 }
0x1270   : > { %p2876_p13 = por %p2875_p12, %p2874_p11 }
0x1271   : > { %s3483_s24 = sadd.s32 4294967295, %s3482_s3  }
0x1272   : > { %p3398_p7 = scmp.eq.s32.totalorder %s3483_s24, 1 }
0x1274   : > { %p2869_p9 = pnand %p2868_p8, %p3398_p7 }
0x1276   : > { %p2870_p10 = pneg %p2869_p9 }
0x1278   : > { %p2877_p0 = pnand %p2876_p13, %p2870_p10 }
0x127a   : > { %2880 = shalt.err (!%p2877_p0)
}
0x127b   : > { %s3485_s4 = sld [smem:[#allocation16_spill]] }
0x1281   : > { %s2881_s26 = scalar_lea.hbm %s3485_s4, 128 }
0x1282   : > { %p2882_p1 = scmp.ne.s32.totalorder %s3485_s4, %s2881_s26  ;;  %p2887_p4 = scmp.lt.u32.totalorder %s2881_s26, %s3485_s4 }
0x1284   : > { %p2883_p2 = pnand %p2882_p1, %p3398_p7 }
0x1286   : > { %p2884_p3 = pneg %p2883_p2 }
0x1288   : > { %p2889_p5 = pnand %p2887_p4, %p2884_p3 }
0x128a   : > { %2892 = shalt.err (!%p2889_p5)
}
0x128b   : > { %s2937_s0 = smov 4  }
0x128c   : > { %2765 = dma.vmem_to_hbm [thread:$0]  (%p3398_p7), %s2303_s27, 128, %s3485_s4, [#allocation4], %s2926_s25, %s2926_s25, %s2937_s0  }
0x128d   : > { %2906 = dma.done.wait (%p3398_p7), [#allocation4], 128  }
0x128e   : > { %2908 = vsyncadd (%p3398_p7), [#allocation4], 4294967168 }
0x128f PF: > { %s3486_s24 = sld [smem:[#allocation7_spill]]  ;;  %s3488_s25 = sld [smem:[#allocation8_spill]] }
0x1295   : > { %s28_s26 = sadd.s32 1, %s3486_s24   ;;  %s3487_s24 = sld [smem:[#allocation6_spill]] }
0x1296   : > { %p25_p6 = scmp.ge.s32.totalorder %s28_s26, 4  }
0x1298   :  { %27 = sbr.rel (!%p25_p6) target bundleno = 10 (0xa), region = 163 }
0x129f   :  { %2318 = vsyncpa [#allocation4], 1 }
0x12a0   :  { %2320 = vsyncpa [#allocation4 + $0x1], 1 }

</bundles_post_ra>
